<compile_context>
chip_gen: v6e
topology: v6e:2x2x1
jax: 0.10.0
libtpu: 0.0.40
codegen_flags: <defaults>
</compile_context>

<pallas_src>
import numpy as np
import jax
import jax.numpy as jnp
from jax.experimental import pallas as pl
from jax.experimental.pallas import tpu as pltpu


# ----------------------------- architecture constants -----------------------------
H_IN, W_IN, C_IN = 16, 16, 4
K = 5
C1, C2 = 16, 32                               # conv output channels
H1, W1 = H_IN - K + 1, W_IN - K + 1           # 12, 12
HP1, WP1 = H1 // 2, W1 // 2                   # 6, 6
H2, W2 = HP1 - K + 1, WP1 - K + 1             # 2, 2
FLAT = C2                                     # after 2nd 2x2 pool spatial is 1x1
FC1, NCLS = 64, 10


# --------------------------------- fused kernel ------------------------------------
def _fused_forward_kernel(x_ref, m1_ref, b1_ref, m2_ref, b2_ref,
                          se_ref, so_ref, wf1_ref, bf1_ref, wf2_ref, bf2_ref,
                          out_ref):
    """Fused CNN forward for one batch tile (bt images), fully batch-vectorized.

    x_ref   [16, bt, 64]   input slab; lane = w*C_IN + ci, batch in sublanes
    m1_ref  [5, 64, 192]   conv1 banded weights (one slab per kernel row kh)
    b1_ref  [1, 192]       conv1 bias tiled over output width (f32)
    m2_ref  [5, 96, 64]    conv2 banded weights
    b2_ref  [1, 64]        conv2 bias tiled over output width (f32)
    se/so   [192, 96]      0/1 lane-selection (even/odd width) for 2x2 pool #1
    wf1/bf1 [32,64]/[1,64] fc1 ;  wf2/bf2 [64,10]/[1,10] fc2
    out_ref [bt, 10]       log-probabilities (f32)
    """
    f32 = jnp.float32
    bt = x_ref.shape[1]
    cdt = x_ref.dtype

    # --- conv1: 5 banded matmuls, M = 12*bt, K = 64, N = 192 ---
    y1 = jnp.dot(x_ref[pl.ds(0, H1), :, :].reshape(H1 * bt, W_IN * C_IN),
                 m1_ref[0], preferred_element_type=f32)
    for kh in range(1, K):
        y1 = y1 + jnp.dot(x_ref[pl.ds(kh, H1), :, :].reshape(H1 * bt, W_IN * C_IN),
                          m1_ref[kh], preferred_element_type=f32)
    y1 = y1 + b1_ref[...]                                     # [12*bt, 192] f32

    # --- 2x2 maxpool + relu ---
    # H-pool on the VPU (elementwise max of even/odd rows), W-pool via 0/1
    # lane-selection matmuls on the MXU (M = 6*bt).
    y1 = y1.reshape(HP1, 2, bt, W1 * C1)
    rows = jnp.maximum(y1[:, 0], y1[:, 1]).reshape(HP1 * bt, W1 * C1).astype(cdt)
    pooled = jnp.maximum(
        jnp.dot(rows, se_ref[...], preferred_element_type=f32),
        jnp.dot(rows, so_ref[...], preferred_element_type=f32))   # [6*bt, 96] f32
    p1 = jnp.maximum(pooled, 0.0).astype(cdt).reshape(HP1, bt, WP1 * C1)
    # dropout2d with p=0 -> identity (no-op)

    # --- conv2: 5 banded matmuls, M = 2*bt, K = 96, N = 64 ---
    y2 = jnp.dot(p1[0:H2].reshape(H2 * bt, WP1 * C1), m2_ref[0],
                 preferred_element_type=f32)
    for kh in range(1, K):
        y2 = y2 + jnp.dot(p1[kh:kh + H2].reshape(H2 * bt, WP1 * C1), m2_ref[kh],
                          preferred_element_type=f32)
    y2 = y2 + b2_ref[...]                                     # [2*bt, 64] f32

    # --- 2x2 maxpool + relu; spatial is 1x1 so this IS the flatten (lane = channel) ---
    y2 = y2.reshape(H2, bt, W2 * C2)
    r = jnp.maximum(y2[0], y2[1])                             # pool over H  -> [bt, 64]
    r = jnp.maximum(r[:, 0:C2], r[:, C2:2 * C2])              # pool over W  -> [bt, 32]
    flat = jnp.maximum(r, 0.0).astype(cdt)

    # --- tail: fc1 + relu, fc2, log_softmax (dropout p=0 -> identity) ---
    h = jnp.dot(flat, wf1_ref[...], preferred_element_type=f32) + bf1_ref[...]
    h = jnp.maximum(h, 0.0).astype(cdt)
    logits = jnp.dot(h, wf2_ref[...], preferred_element_type=f32) + bf2_ref[...]
    s = logits - jnp.max(logits, axis=-1, keepdims=True)
    out_ref[...] = (s - jnp.log(jnp.sum(jnp.exp(s), axis=-1, keepdims=True))
                    ).astype(out_ref.dtype)


# --------------------------- parameters & one-time packing --------------------------
def init_params(key):
    ks = jax.random.split(key, 8)

    def w(k, shape, fan_in):
        return jax.random.normal(k, shape, jnp.float32) / jnp.sqrt(fan_in)

    return {
        "conv1_w": w(ks[0], (C1, C_IN, K, K), C_IN * K * K),   # PyTorch OIHW
        "conv1_b": 0.1 * jax.random.normal(ks[1], (C1,), jnp.float32),
        "conv2_w": w(ks[2], (C2, C1, K, K), C1 * K * K),
        "conv2_b": 0.1 * jax.random.normal(ks[3], (C2,), jnp.float32),
        "fc1_w":   w(ks[4], (FLAT, FC1), FLAT),                # [in, out]
        "fc1_b":   0.1 * jax.random.normal(ks[5], (FC1,), jnp.float32),
        "fc2_w":   w(ks[6], (FC1, NCLS), FC1),
        "fc2_b":   0.1 * jax.random.normal(ks[7], (NCLS,), jnp.float32),
    }


def prepare_params(params, compute_dtype=jnp.bfloat16):
    """One-time packing of PyTorch-layout weights into lane-dense kernel layouts.

    Matmul operands are cast to `compute_dtype` (bf16 by default: v6e/v7x MXU rate,
    half the bytes); biases stay f32 (added on the f32 accumulators).
    """
    f32 = jnp.float32
    cdt = compute_dtype
    w1 = params["conv1_w"].astype(f32)                                  # [C1, C_IN, K, K]
    w2 = params["conv2_w"].astype(f32)                                  # [C2, C1,  K, K]

    # conv1 banded weights: m1[kh, wj*C_IN + ci, wo*C1 + co] = w1[co, ci, kh, wj - wo]
    band1 = jnp.transpose(w1, (2, 3, 1, 0)).reshape(K, K * C_IN, C1)    # [kh, kw*ci, co]
    m1 = jnp.zeros((K, W_IN * C_IN, W1 * C1), f32)
    for wo in range(W1):
        m1 = m1.at[:, wo * C_IN:(wo + K) * C_IN, wo * C1:(wo + 1) * C1].set(band1)

    # conv2 banded weights: m2[kh, wj*C1 + ci, wo*C2 + co] = w2[co, ci, kh, wj - wo]
    band2 = jnp.transpose(w2, (2, 3, 1, 0)).reshape(K, K * C1, C2)      # [kh, kw*ci, co]
    m2 = jnp.zeros((K, WP1 * C1, W2 * C2), f32)
    for wo in range(W2):
        m2 = m2.at[:, wo * C1:(wo + K) * C1, wo * C2:(wo + 1) * C2].set(band2)

    # 0/1 lane-selection matrices for the first 2x2 max-pool (exact in bf16).
    q = np.arange(WP1 * C1)
    se = np.zeros((W1 * C1, WP1 * C1), np.float32)
    so = np.zeros((W1 * C1, WP1 * C1), np.float32)
    se[2 * C1 * (q // C1) + (q % C1), q] = 1.0
    so[2 * C1 * (q // C1) + C1 + (q % C1), q] = 1.0

    return {
        "m1": m1.astype(cdt),
        "b1row": jnp.tile(params["conv1_b"].astype(f32), W1)[None, :],
        "m2": m2.astype(cdt),
        "b2row": jnp.tile(params["conv2_b"].astype(f32), W2)[None, :],
        "se": jnp.asarray(se, cdt), "so": jnp.asarray(so, cdt),
        "fc1_w": params["fc1_w"].astype(cdt),
        "fc1_b": params["fc1_b"].astype(f32)[None, :],
        "fc2_w": params["fc2_w"].astype(cdt),
        "fc2_b": params["fc2_b"].astype(f32)[None, :],
    }


# ----------------------------------- forward ----------------------------------------
def _round_up(n, m):
    return ((n + m - 1) // m) * m


def no_dropout_model_forward(prep, x_nchw, *, batch_tile=128):
    """Equivalent of NoDropoutModel.forward: dropout p=0, k=1 MC sample, squeeze(1) -> [B, 10]."""
    B = x_nchw.shape[0]
    cdt = prep["m1"].dtype
    # NCHW -> [H, B, W*C]: batch in the sublane/M position so every matmul in the
    # kernel is batched over the whole tile (lane = w*C_IN + ci).
    x = jnp.transpose(x_nchw, (2, 0, 3, 1)).reshape(H_IN, B, W_IN * C_IN).astype(cdt)

    bt = max(8, min(_round_up(batch_tile, 8), _round_up(B, 8)))   # multiple of 8 sublanes
    b_pad = _round_up(B, bt)
    if b_pad != B:
        x = jnp.pad(x, ((0, 0), (0, b_pad - B), (0, 0)))
    # NOTE: on v7x megacore, pick batch_tile so that b_pad // bt >= 2 (even) when B is
    # large enough — otherwise one TensorCore idles.

    def full(a):  # whole-array block, resident every grid step
        return pl.BlockSpec(a.shape, lambda i, _n=a.ndim: (0,) * _n)

    out = pl.pallas_call(
        _fused_forward_kernel,
        out_shape=jax.ShapeDtypeStruct((b_pad, NCLS), jnp.float32),
        grid_spec=pltpu.PrefetchScalarGridSpec(
            num_scalar_prefetch=0,
            grid=(b_pad // bt,),
            in_specs=[
                pl.BlockSpec((H_IN, bt, W_IN * C_IN), lambda i: (0, i, 0)),
                full(prep["m1"]), full(prep["b1row"]),
                full(prep["m2"]), full(prep["b2row"]),
                full(prep["se"]), full(prep["so"]),
                full(prep["fc1_w"]), full(prep["fc1_b"]),
                full(prep["fc2_w"]), full(prep["fc2_b"]),
            ],
            out_specs=pl.BlockSpec((bt, NCLS), lambda i: (i, 0)),
        ),
        compiler_params=pltpu.CompilerParams(
            dimension_semantics=("parallel",),              # batch tiles split across cores
            vmem_limit_bytes=32 * 1024 * 1024,              # safe on v5e/v6e/v7x
        ),
    )(x, prep["m1"], prep["b1row"], prep["m2"], prep["b2row"],
      prep["se"], prep["so"],
      prep["fc1_w"], prep["fc1_b"], prep["fc2_w"], prep["fc2_b"])

    # MC dim k=1 with p=0 dropout is deterministic: [B,1,C].squeeze(1) == [B,C].
    return out[:B]


# ----------------------------- pure-JAX reference (check) ---------------------------
def reference_forward(params, x_nchw):
    hi = jax.lax.Precision.HIGHEST
    x = jnp.transpose(x_nchw, (0, 2, 3, 1)).astype(jnp.float32)

    def conv(xx, w, b):
        Bn, Hh, Ww, Cin = xx.shape
        Cout, _, k, _ = w.shape
        Ho, Wo = Hh - k + 1, Ww - k + 1
        patches = [xx[:, di:di + Ho, dj:dj + Wo, :] for di in range(k) for dj in range(k)]
        p = jnp.concatenate(patches, axis=-1).reshape(Bn * Ho * Wo, k * k * Cin)
        w2d = jnp.transpose(w, (2, 3, 1, 0)).reshape(k * k * Cin, Cout)
        return (jnp.dot(p, w2d, precision=hi) + b).reshape(Bn, Ho, Wo, Cout)

    def pool_relu(y):
        Bn, Hh, Ww, C = y.shape
        y = y.reshape(Bn, Hh // 2, 2, Ww // 2, 2, C).max(axis=(2, 4))
        return jnp.maximum(y, 0.0)

    y = pool_relu(conv(x, params["conv1_w"], params["conv1_b"]))
    y = pool_relu(conv(y, params["conv2_w"], params["conv2_b"]))
    Bn = y.shape[0]
    y = jnp.transpose(y, (0, 3, 1, 2)).reshape(Bn, -1)                 # NCHW-order flatten
    y = jnp.maximum(jnp.dot(y, params["fc1_w"], precision=hi) + params["fc1_b"], 0.0)
    y = jnp.dot(y, params["fc2_w"], precision=hi) + params["fc2_b"]
    return jax.nn.log_softmax(y, axis=-1)


# -------------------------------------- main -----------------------------------------
if __name__ == "__main__":
    key = jax.random.PRNGKey(0)
    pkey, xkey = jax.random.split(key)
    params = init_params(pkey)
    prep = prepare_params(params)                       # one-time weight packing (bf16 operands)
    x = jax.random.normal(xkey, (2, C_IN, H_IN, W_IN), jnp.float32)   # NCHW, B=2

    fwd = jax.jit(no_dropout_model_forward)
    out = jax.block_until_ready(fwd(prep, x))

    assert out.shape == (2, NCLS), out.shape
    # log-probabilities: each row sums to 1 in probability space
    assert bool(jnp.allclose(jnp.exp(out).sum(-1), 1.0, atol=1e-3))
    # match the pure-JAX f32 reference (bf16 MXU operands + f32 accumulation -> ~1e-2 error)
    ref = reference_forward(params, x)
    max_err = float(jnp.max(jnp.abs(out - ref)))
    assert max_err < 1e-1, max_err
    print("KERNEL_OK")
</pallas_src>

<mosaic_0001>
module attributes {stable_mosaic.version = 11 : i64} {
  func.func @_fused_forward_kernel(%arg0: i32, %arg1: memref<16x8x64xbf16, #tpu.memory_space<vmem>>, %arg2: memref<5x64x192xbf16, #tpu.memory_space<vmem>>, %arg3: memref<1x192xf32, #tpu.memory_space<vmem>>, %arg4: memref<5x96x64xbf16, #tpu.memory_space<vmem>>, %arg5: memref<1x64xf32, #tpu.memory_space<vmem>>, %arg6: memref<192x96xbf16, #tpu.memory_space<vmem>>, %arg7: memref<192x96xbf16, #tpu.memory_space<vmem>>, %arg8: memref<32x64xbf16, #tpu.memory_space<vmem>>, %arg9: memref<1x64xf32, #tpu.memory_space<vmem>>, %arg10: memref<64x10xbf16, #tpu.memory_space<vmem>>, %arg11: memref<1x10xf32, #tpu.memory_space<vmem>>, %arg12: memref<8x10xf32, #tpu.memory_space<vmem>>) attributes {dimension_semantics = [#tpu.dimension_semantics<parallel>], iteration_bounds = array<i64: 1>, scalar_prefetch = 0 : i64, scratch_operands = 0 : i64, tpu.core_type = #tpu.core_type<tc>, window_params = [{transform_indices = @transform_0, window_bounds = array<i64: 16, 8, 64>}, {pipeline_mode = #tpu.pipeline_mode<synchronous>, transform_indices = @transform_1, window_bounds = array<i64: 5, 64, 192>}, {pipeline_mode = #tpu.pipeline_mode<synchronous>, transform_indices = @transform_2, window_bounds = array<i64: 1, 192>}, {pipeline_mode = #tpu.pipeline_mode<synchronous>, transform_indices = @transform_3, window_bounds = array<i64: 5, 96, 64>}, {pipeline_mode = #tpu.pipeline_mode<synchronous>, transform_indices = @transform_4, window_bounds = array<i64: 1, 64>}, {pipeline_mode = #tpu.pipeline_mode<synchronous>, transform_indices = @transform_5, window_bounds = array<i64: 192, 96>}, {pipeline_mode = #tpu.pipeline_mode<synchronous>, transform_indices = @transform_6, window_bounds = array<i64: 192, 96>}, {pipeline_mode = #tpu.pipeline_mode<synchronous>, transform_indices = @transform_7, window_bounds = array<i64: 32, 64>}, {pipeline_mode = #tpu.pipeline_mode<synchronous>, transform_indices = @transform_8, window_bounds = array<i64: 1, 64>}, {pipeline_mode = #tpu.pipeline_mode<synchronous>, transform_indices = @transform_9, window_bounds = array<i64: 64, 10>}, {pipeline_mode = #tpu.pipeline_mode<synchronous>, transform_indices = @transform_10, window_bounds = array<i64: 1, 10>}, {transform_indices = @transform_11, window_bounds = array<i64: 8, 10>}]} {
    %c0 = arith.constant 0 : index
    %c0_0 = arith.constant 0 : index
    %c0_1 = arith.constant 0 : index
    %0 = vector.load %arg1[%c0, %c0_0, %c0_1] : memref<16x8x64xbf16, #tpu.memory_space<vmem>>, vector<12x8x64xbf16>
    %1 = vector.shape_cast %0 : vector<12x8x64xbf16> to vector<96x64xbf16>
    %c0_2 = arith.constant 0 : index
    %c0_3 = arith.constant 0 : index
    %c0_4 = arith.constant 0 : index
    %2 = vector.load %arg2[%c0_2, %c0_3, %c0_4] : memref<5x64x192xbf16, #tpu.memory_space<vmem>>, vector<1x64x192xbf16>
    %3 = vector.shape_cast %2 : vector<1x64x192xbf16> to vector<64x192xbf16>
    %cst = arith.constant dense<0.000000e+00> : vector<96x192xf32>
    %4 = tpu.matmul %1, %3, %cst {dimension_numbers = #tpu.dot_dimension_numbers<[1], [0], [0], [1], [0, 0, 1, 1], [], []>} : vector<96x64xbf16>, vector<64x192xbf16>, vector<96x192xf32> -> vector<96x192xf32>
    %c1 = arith.constant 1 : index
    %c0_5 = arith.constant 0 : index
    %c0_6 = arith.constant 0 : index
    %5 = vector.load %arg1[%c1, %c0_5, %c0_6] : memref<16x8x64xbf16, #tpu.memory_space<vmem>>, vector<12x8x64xbf16>
    %6 = vector.shape_cast %5 : vector<12x8x64xbf16> to vector<96x64xbf16>
    %c1_7 = arith.constant 1 : index
    %c0_8 = arith.constant 0 : index
    %c0_9 = arith.constant 0 : index
    %7 = vector.load %arg2[%c1_7, %c0_8, %c0_9] : memref<5x64x192xbf16, #tpu.memory_space<vmem>>, vector<1x64x192xbf16>
    %8 = vector.shape_cast %7 : vector<1x64x192xbf16> to vector<64x192xbf16>
    %cst_10 = arith.constant dense<0.000000e+00> : vector<96x192xf32>
    %9 = tpu.matmul %6, %8, %cst_10 {dimension_numbers = #tpu.dot_dimension_numbers<[1], [0], [0], [1], [0, 0, 1, 1], [], []>} : vector<96x64xbf16>, vector<64x192xbf16>, vector<96x192xf32> -> vector<96x192xf32>
    %10 = arith.addf %4, %9 : vector<96x192xf32>
    %c2 = arith.constant 2 : index
    %c0_11 = arith.constant 0 : index
    %c0_12 = arith.constant 0 : index
    %11 = vector.load %arg1[%c2, %c0_11, %c0_12] : memref<16x8x64xbf16, #tpu.memory_space<vmem>>, vector<12x8x64xbf16>
    %12 = vector.shape_cast %11 : vector<12x8x64xbf16> to vector<96x64xbf16>
    %c2_13 = arith.constant 2 : index
    %c0_14 = arith.constant 0 : index
    %c0_15 = arith.constant 0 : index
    %13 = vector.load %arg2[%c2_13, %c0_14, %c0_15] : memref<5x64x192xbf16, #tpu.memory_space<vmem>>, vector<1x64x192xbf16>
    %14 = vector.shape_cast %13 : vector<1x64x192xbf16> to vector<64x192xbf16>
    %cst_16 = arith.constant dense<0.000000e+00> : vector<96x192xf32>
    %15 = tpu.matmul %12, %14, %cst_16 {dimension_numbers = #tpu.dot_dimension_numbers<[1], [0], [0], [1], [0, 0, 1, 1], [], []>} : vector<96x64xbf16>, vector<64x192xbf16>, vector<96x192xf32> -> vector<96x192xf32>
    %16 = arith.addf %10, %15 : vector<96x192xf32>
    %c3 = arith.constant 3 : index
    %c0_17 = arith.constant 0 : index
    %c0_18 = arith.constant 0 : index
    %17 = vector.load %arg1[%c3, %c0_17, %c0_18] : memref<16x8x64xbf16, #tpu.memory_space<vmem>>, vector<12x8x64xbf16>
    %18 = vector.shape_cast %17 : vector<12x8x64xbf16> to vector<96x64xbf16>
    %c3_19 = arith.constant 3 : index
    %c0_20 = arith.constant 0 : index
    %c0_21 = arith.constant 0 : index
    %19 = vector.load %arg2[%c3_19, %c0_20, %c0_21] : memref<5x64x192xbf16, #tpu.memory_space<vmem>>, vector<1x64x192xbf16>
    %20 = vector.shape_cast %19 : vector<1x64x192xbf16> to vector<64x192xbf16>
    %cst_22 = arith.constant dense<0.000000e+00> : vector<96x192xf32>
    %21 = tpu.matmul %18, %20, %cst_22 {dimension_numbers = #tpu.dot_dimension_numbers<[1], [0], [0], [1], [0, 0, 1, 1], [], []>} : vector<96x64xbf16>, vector<64x192xbf16>, vector<96x192xf32> -> vector<96x192xf32>
    %22 = arith.addf %16, %21 : vector<96x192xf32>
    %c4 = arith.constant 4 : index
    %c0_23 = arith.constant 0 : index
    %c0_24 = arith.constant 0 : index
    %23 = vector.load %arg1[%c4, %c0_23, %c0_24] : memref<16x8x64xbf16, #tpu.memory_space<vmem>>, vector<12x8x64xbf16>
    %24 = vector.shape_cast %23 : vector<12x8x64xbf16> to vector<96x64xbf16>
    %c4_25 = arith.constant 4 : index
    %c0_26 = arith.constant 0 : index
    %c0_27 = arith.constant 0 : index
    %25 = vector.load %arg2[%c4_25, %c0_26, %c0_27] : memref<5x64x192xbf16, #tpu.memory_space<vmem>>, vector<1x64x192xbf16>
    %26 = vector.shape_cast %25 : vector<1x64x192xbf16> to vector<64x192xbf16>
    %cst_28 = arith.constant dense<0.000000e+00> : vector<96x192xf32>
    %27 = tpu.matmul %24, %26, %cst_28 {dimension_numbers = #tpu.dot_dimension_numbers<[1], [0], [0], [1], [0, 0, 1, 1], [], []>} : vector<96x64xbf16>, vector<64x192xbf16>, vector<96x192xf32> -> vector<96x192xf32>
    %28 = arith.addf %22, %27 : vector<96x192xf32>
    %c0_29 = arith.constant 0 : index
    %c0_30 = arith.constant 0 : index
    %29 = vector.load %arg3[%c0_29, %c0_30] : memref<1x192xf32, #tpu.memory_space<vmem>>, vector<1x192xf32>
    %30 = vector.broadcast %29 : vector<1x192xf32> to vector<96x192xf32>
    %31 = arith.addf %28, %30 : vector<96x192xf32>
    %32 = vector.shape_cast %31 : vector<96x192xf32> to vector<6x2x8x192xf32>
    %33 = vector.extract_strided_slice %32 {offsets = [0, 0, 0, 0], sizes = [6, 1, 8, 192], strides = [1, 1, 1, 1]} : vector<6x2x8x192xf32> to vector<6x1x8x192xf32>
    %34 = vector.shape_cast %33 : vector<6x1x8x192xf32> to vector<6x8x192xf32>
    %35 = vector.extract_strided_slice %32 {offsets = [0, 1, 0, 0], sizes = [6, 1, 8, 192], strides = [1, 1, 1, 1]} : vector<6x2x8x192xf32> to vector<6x1x8x192xf32>
    %36 = vector.shape_cast %35 : vector<6x1x8x192xf32> to vector<6x8x192xf32>
    %37 = arith.maximumf %34, %36 : vector<6x8x192xf32>
    %38 = vector.shape_cast %37 : vector<6x8x192xf32> to vector<48x192xf32>
    %39 = arith.truncf %38 : vector<48x192xf32> to vector<48x192xbf16>
    %c0_31 = arith.constant 0 : index
    %c0_32 = arith.constant 0 : index
    %40 = vector.load %arg6[%c0_31, %c0_32] : memref<192x96xbf16, #tpu.memory_space<vmem>>, vector<192x96xbf16>
    %cst_33 = arith.constant dense<0.000000e+00> : vector<48x96xf32>
    %41 = tpu.matmul %39, %40, %cst_33 {dimension_numbers = #tpu.dot_dimension_numbers<[1], [0], [0], [1], [0, 0, 1, 1], [], []>} : vector<48x192xbf16>, vector<192x96xbf16>, vector<48x96xf32> -> vector<48x96xf32>
    %c0_34 = arith.constant 0 : index
    %c0_35 = arith.constant 0 : index
    %42 = vector.load %arg7[%c0_34, %c0_35] : memref<192x96xbf16, #tpu.memory_space<vmem>>, vector<192x96xbf16>
    %cst_36 = arith.constant dense<0.000000e+00> : vector<48x96xf32>
    %43 = tpu.matmul %39, %42, %cst_36 {dimension_numbers = #tpu.dot_dimension_numbers<[1], [0], [0], [1], [0, 0, 1, 1], [], []>} : vector<48x192xbf16>, vector<192x96xbf16>, vector<48x96xf32> -> vector<48x96xf32>
    %44 = arith.maximumf %41, %43 : vector<48x96xf32>
    %cst_37 = arith.constant 0.000000e+00 : f32
    %45 = vector.broadcast %cst_37 : f32 to vector<48x96xf32>
    %46 = arith.maximumf %44, %45 : vector<48x96xf32>
    %47 = arith.truncf %46 : vector<48x96xf32> to vector<48x96xbf16>
    %48 = vector.shape_cast %47 : vector<48x96xbf16> to vector<6x8x96xbf16>
    %49 = vector.extract_strided_slice %48 {offsets = [0, 0, 0], sizes = [2, 8, 96], strides = [1, 1, 1]} : vector<6x8x96xbf16> to vector<2x8x96xbf16>
    %50 = vector.shape_cast %49 : vector<2x8x96xbf16> to vector<16x96xbf16>
    %c0_38 = arith.constant 0 : index
    %c0_39 = arith.constant 0 : index
    %c0_40 = arith.constant 0 : index
    %51 = vector.load %arg4[%c0_38, %c0_39, %c0_40] : memref<5x96x64xbf16, #tpu.memory_space<vmem>>, vector<1x96x64xbf16>
    %52 = vector.shape_cast %51 : vector<1x96x64xbf16> to vector<96x64xbf16>
    %cst_41 = arith.constant dense<0.000000e+00> : vector<16x64xf32>
    %53 = tpu.matmul %50, %52, %cst_41 {dimension_numbers = #tpu.dot_dimension_numbers<[1], [0], [0], [1], [0, 0, 1, 1], [], []>} : vector<16x96xbf16>, vector<96x64xbf16>, vector<16x64xf32> -> vector<16x64xf32>
    %54 = vector.extract_strided_slice %48 {offsets = [1, 0, 0], sizes = [2, 8, 96], strides = [1, 1, 1]} : vector<6x8x96xbf16> to vector<2x8x96xbf16>
    %55 = vector.shape_cast %54 : vector<2x8x96xbf16> to vector<16x96xbf16>
    %c1_42 = arith.constant 1 : index
    %c0_43 = arith.constant 0 : index
    %c0_44 = arith.constant 0 : index
    %56 = vector.load %arg4[%c1_42, %c0_43, %c0_44] : memref<5x96x64xbf16, #tpu.memory_space<vmem>>, vector<1x96x64xbf16>
    %57 = vector.shape_cast %56 : vector<1x96x64xbf16> to vector<96x64xbf16>
    %cst_45 = arith.constant dense<0.000000e+00> : vector<16x64xf32>
    %58 = tpu.matmul %55, %57, %cst_45 {dimension_numbers = #tpu.dot_dimension_numbers<[1], [0], [0], [1], [0, 0, 1, 1], [], []>} : vector<16x96xbf16>, vector<96x64xbf16>, vector<16x64xf32> -> vector<16x64xf32>
    %59 = arith.addf %53, %58 : vector<16x64xf32>
    %60 = vector.extract_strided_slice %48 {offsets = [2, 0, 0], sizes = [2, 8, 96], strides = [1, 1, 1]} : vector<6x8x96xbf16> to vector<2x8x96xbf16>
    %61 = vector.shape_cast %60 : vector<2x8x96xbf16> to vector<16x96xbf16>
    %c2_46 = arith.constant 2 : index
    %c0_47 = arith.constant 0 : index
    %c0_48 = arith.constant 0 : index
    %62 = vector.load %arg4[%c2_46, %c0_47, %c0_48] : memref<5x96x64xbf16, #tpu.memory_space<vmem>>, vector<1x96x64xbf16>
    %63 = vector.shape_cast %62 : vector<1x96x64xbf16> to vector<96x64xbf16>
    %cst_49 = arith.constant dense<0.000000e+00> : vector<16x64xf32>
    %64 = tpu.matmul %61, %63, %cst_49 {dimension_numbers = #tpu.dot_dimension_numbers<[1], [0], [0], [1], [0, 0, 1, 1], [], []>} : vector<16x96xbf16>, vector<96x64xbf16>, vector<16x64xf32> -> vector<16x64xf32>
    %65 = arith.addf %59, %64 : vector<16x64xf32>
    %66 = vector.extract_strided_slice %48 {offsets = [3, 0, 0], sizes = [2, 8, 96], strides = [1, 1, 1]} : vector<6x8x96xbf16> to vector<2x8x96xbf16>
    %67 = vector.shape_cast %66 : vector<2x8x96xbf16> to vector<16x96xbf16>
    %c3_50 = arith.constant 3 : index
    %c0_51 = arith.constant 0 : index
    %c0_52 = arith.constant 0 : index
    %68 = vector.load %arg4[%c3_50, %c0_51, %c0_52] : memref<5x96x64xbf16, #tpu.memory_space<vmem>>, vector<1x96x64xbf16>
    %69 = vector.shape_cast %68 : vector<1x96x64xbf16> to vector<96x64xbf16>
    %cst_53 = arith.constant dense<0.000000e+00> : vector<16x64xf32>
    %70 = tpu.matmul %67, %69, %cst_53 {dimension_numbers = #tpu.dot_dimension_numbers<[1], [0], [0], [1], [0, 0, 1, 1], [], []>} : vector<16x96xbf16>, vector<96x64xbf16>, vector<16x64xf32> -> vector<16x64xf32>
    %71 = arith.addf %65, %70 : vector<16x64xf32>
    %72 = vector.extract_strided_slice %48 {offsets = [4, 0, 0], sizes = [2, 8, 96], strides = [1, 1, 1]} : vector<6x8x96xbf16> to vector<2x8x96xbf16>
    %73 = vector.shape_cast %72 : vector<2x8x96xbf16> to vector<16x96xbf16>
    %c4_54 = arith.constant 4 : index
    %c0_55 = arith.constant 0 : index
    %c0_56 = arith.constant 0 : index
    %74 = vector.load %arg4[%c4_54, %c0_55, %c0_56] : memref<5x96x64xbf16, #tpu.memory_space<vmem>>, vector<1x96x64xbf16>
    %75 = vector.shape_cast %74 : vector<1x96x64xbf16> to vector<96x64xbf16>
    %cst_57 = arith.constant dense<0.000000e+00> : vector<16x64xf32>
    %76 = tpu.matmul %73, %75, %cst_57 {dimension_numbers = #tpu.dot_dimension_numbers<[1], [0], [0], [1], [0, 0, 1, 1], [], []>} : vector<16x96xbf16>, vector<96x64xbf16>, vector<16x64xf32> -> vector<16x64xf32>
    %77 = arith.addf %71, %76 : vector<16x64xf32>
    %c0_58 = arith.constant 0 : index
    %c0_59 = arith.constant 0 : index
    %78 = vector.load %arg5[%c0_58, %c0_59] : memref<1x64xf32, #tpu.memory_space<vmem>>, vector<1x64xf32>
    %79 = vector.broadcast %78 : vector<1x64xf32> to vector<16x64xf32>
    %80 = arith.addf %77, %79 : vector<16x64xf32>
    %81 = vector.shape_cast %80 : vector<16x64xf32> to vector<2x8x64xf32>
    %82 = vector.extract_strided_slice %81 {offsets = [0, 0, 0], sizes = [1, 8, 64], strides = [1, 1, 1]} : vector<2x8x64xf32> to vector<1x8x64xf32>
    %83 = vector.shape_cast %82 : vector<1x8x64xf32> to vector<8x64xf32>
    %84 = vector.extract_strided_slice %81 {offsets = [1, 0, 0], sizes = [1, 8, 64], strides = [1, 1, 1]} : vector<2x8x64xf32> to vector<1x8x64xf32>
    %85 = vector.shape_cast %84 : vector<1x8x64xf32> to vector<8x64xf32>
    %86 = arith.maximumf %83, %85 : vector<8x64xf32>
    %87 = vector.extract_strided_slice %86 {offsets = [0, 0], sizes = [8, 32], strides = [1, 1]} : vector<8x64xf32> to vector<8x32xf32>
    %88 = vector.extract_strided_slice %86 {offsets = [0, 32], sizes = [8, 32], strides = [1, 1]} : vector<8x64xf32> to vector<8x32xf32>
    %89 = arith.maximumf %87, %88 : vector<8x32xf32>
    %cst_60 = arith.constant 0.000000e+00 : f32
    %90 = vector.broadcast %cst_60 : f32 to vector<8x32xf32>
    %91 = arith.maximumf %89, %90 : vector<8x32xf32>
    %92 = arith.truncf %91 : vector<8x32xf32> to vector<8x32xbf16>
    %c0_61 = arith.constant 0 : index
    %c0_62 = arith.constant 0 : index
    %93 = vector.load %arg8[%c0_61, %c0_62] : memref<32x64xbf16, #tpu.memory_space<vmem>>, vector<32x64xbf16>
    %cst_63 = arith.constant dense<0.000000e+00> : vector<8x64xf32>
    %94 = tpu.matmul %92, %93, %cst_63 {dimension_numbers = #tpu.dot_dimension_numbers<[1], [0], [0], [1], [0, 0, 1, 1], [], []>} : vector<8x32xbf16>, vector<32x64xbf16>, vector<8x64xf32> -> vector<8x64xf32>
    %c0_64 = arith.constant 0 : index
    %c0_65 = arith.constant 0 : index
    %95 = vector.load %arg9[%c0_64, %c0_65] : memref<1x64xf32, #tpu.memory_space<vmem>>, vector<1x64xf32>
    %96 = vector.broadcast %95 : vector<1x64xf32> to vector<8x64xf32>
    %97 = arith.addf %94, %96 : vector<8x64xf32>
    %cst_66 = arith.constant 0.000000e+00 : f32
    %98 = vector.broadcast %cst_66 : f32 to vector<8x64xf32>
    %99 = arith.maximumf %97, %98 : vector<8x64xf32>
    %100 = arith.truncf %99 : vector<8x64xf32> to vector<8x64xbf16>
    %c0_67 = arith.constant 0 : index
    %c0_68 = arith.constant 0 : index
    %101 = vector.load %arg10[%c0_67, %c0_68] : memref<64x10xbf16, #tpu.memory_space<vmem>>, vector<64x10xbf16>
    %cst_69 = arith.constant dense<0.000000e+00> : vector<8x10xf32>
    %102 = tpu.matmul %100, %101, %cst_69 {dimension_numbers = #tpu.dot_dimension_numbers<[1], [0], [0], [1], [0, 0, 1, 1], [], []>} : vector<8x64xbf16>, vector<64x10xbf16>, vector<8x10xf32> -> vector<8x10xf32>
    %c0_70 = arith.constant 0 : index
    %c0_71 = arith.constant 0 : index
    %103 = vector.load %arg11[%c0_70, %c0_71] : memref<1x10xf32, #tpu.memory_space<vmem>>, vector<1x10xf32>
    %104 = vector.broadcast %103 : vector<1x10xf32> to vector<8x10xf32>
    %105 = arith.addf %102, %104 : vector<8x10xf32>
    %cst_72 = arith.constant dense<0xFF800000> : vector<8xf32>
    %106 = vector.multi_reduction <maximumf>, %105, %cst_72 [1] : vector<8x10xf32> to vector<8xf32>
    %107 = vector.shape_cast %106 : vector<8xf32> to vector<8x1xf32>
    %108 = vector.broadcast %107 : vector<8x1xf32> to vector<8x10xf32>
    %109 = arith.subf %105, %108 : vector<8x10xf32>
    %110 = math.exp %109 : vector<8x10xf32>
    %cst_73 = arith.constant dense<0.000000e+00> : vector<8xf32>
    %111 = vector.multi_reduction <add>, %110, %cst_73 [1] : vector<8x10xf32> to vector<8xf32>
    %112 = vector.shape_cast %111 : vector<8xf32> to vector<8x1xf32>
    %113 = math.log %112 : vector<8x1xf32>
    %114 = vector.broadcast %113 : vector<8x1xf32> to vector<8x10xf32>
    %115 = arith.subf %109, %114 : vector<8x10xf32>
    %c0_74 = arith.constant 0 : index
    %c0_75 = arith.constant 0 : index
    %116 = vector.load %arg12[%c0_74, %c0_75] : memref<8x10xf32, #tpu.memory_space<vmem>>, vector<8x10xf32>
    tpu.vector_store %arg12[%c0_74, %c0_75], %115 {strides = array<i32>} : memref<8x10xf32, #tpu.memory_space<vmem>>, vector<8x10xf32>,
    return
  }
  func.func @transform_0(%arg0: i32) -> (i32, i32, i32) {
    %c0_i32 = arith.constant 0 : i32
    %c0_i32_0 = arith.constant 0 : i32
    %c0_i32_1 = arith.constant 0 : i32
    return %c0_i32, %arg0, %c0_i32_0 : i32, i32, i32
  }
  func.func @transform_1(%arg0: i32) -> (i32, i32, i32) {
    %c0_i32 = arith.constant 0 : i32
    %c0_i32_0 = arith.constant 0 : i32
    %c0_i32_1 = arith.constant 0 : i32
    %c0_i32_2 = arith.constant 0 : i32
    return %c0_i32, %c0_i32_0, %c0_i32_1 : i32, i32, i32
  }
  func.func @transform_2(%arg0: i32) -> (i32, i32) {
    %c0_i32 = arith.constant 0 : i32
    %c0_i32_0 = arith.constant 0 : i32
    %c0_i32_1 = arith.constant 0 : i32
    return %c0_i32, %c0_i32_0 : i32, i32
  }
  func.func @transform_3(%arg0: i32) -> (i32, i32, i32) {
    %c0_i32 = arith.constant 0 : i32
    %c0_i32_0 = arith.constant 0 : i32
    %c0_i32_1 = arith.constant 0 : i32
    %c0_i32_2 = arith.constant 0 : i32
    return %c0_i32, %c0_i32_0, %c0_i32_1 : i32, i32, i32
  }
  func.func @transform_4(%arg0: i32) -> (i32, i32) {
    %c0_i32 = arith.constant 0 : i32
    %c0_i32_0 = arith.constant 0 : i32
    %c0_i32_1 = arith.constant 0 : i32
    return %c0_i32, %c0_i32_0 : i32, i32
  }
  func.func @transform_5(%arg0: i32) -> (i32, i32) {
    %c0_i32 = arith.constant 0 : i32
    %c0_i32_0 = arith.constant 0 : i32
    %c0_i32_1 = arith.constant 0 : i32
    return %c0_i32, %c0_i32_0 : i32, i32
  }
  func.func @transform_6(%arg0: i32) -> (i32, i32) {
    %c0_i32 = arith.constant 0 : i32
    %c0_i32_0 = arith.constant 0 : i32
    %c0_i32_1 = arith.constant 0 : i32
    return %c0_i32, %c0_i32_0 : i32, i32
  }
  func.func @transform_7(%arg0: i32) -> (i32, i32) {
    %c0_i32 = arith.constant 0 : i32
    %c0_i32_0 = arith.constant 0 : i32
    %c0_i32_1 = arith.constant 0 : i32
    return %c0_i32, %c0_i32_0 : i32, i32
  }
  func.func @transform_8(%arg0: i32) -> (i32, i32) {
    %c0_i32 = arith.constant 0 : i32
    %c0_i32_0 = arith.constant 0 : i32
    %c0_i32_1 = arith.constant 0 : i32
    return %c0_i32, %c0_i32_0 : i32, i32
  }
  func.func @transform_9(%arg0: i32) -> (i32, i32) {
    %c0_i32 = arith.constant 0 : i32
    %c0_i32_0 = arith.constant 0 : i32
    %c0_i32_1 = arith.constant 0 : i32
    return %c0_i32, %c0_i32_0 : i32, i32
  }
  func.func @transform_10(%arg0: i32) -> (i32, i32) {
    %c0_i32 = arith.constant 0 : i32
    %c0_i32_0 = arith.constant 0 : i32
    %c0_i32_1 = arith.constant 0 : i32
    return %c0_i32, %c0_i32_0 : i32, i32
  }
  func.func @transform_11(%arg0: i32) -> (i32, i32) {
    %c0_i32 = arith.constant 0 : i32
    %c0_i32_0 = arith.constant 0 : i32
    return %arg0, %c0_i32 : i32, i32
  }
}

</mosaic_0001>

<bundles_post_ra>
// kernel: no_dropout_model_forward.1
= control target key start
LH: loop header
LB: loop body
LE: loop exit
PB: predicated region body
PF: predicated region fallthrough
CT: control target
= control target key end

     0   :  { %v2785_v1 = vmov 0   ;;  %vm151_vm0 = vcmask 523264   ;;  %vm2787_vm1 = vmmov 0   ;;  %vm1580_vm2 = vcmask 785408   ;;  %s2788_s23 = smov 96   ;;  %s3670_s1 = inlined_call_operand.vmem [shape: bf16[5,64,192], index: 1, kind: input, shape index: {}]   ;;  %s3671_s0 = inlined_call_operand.vmem [shape: bf16[16,8,64], index: 0, kind: input, shape index: {}]   ;;  %s3672_s5 = inlined_call_operand.vmem [shape: bf16[192,96], index: 5, kind: input, shape index: {}]   ;;  %s3673_s6 = inlined_call_operand.vmem [shape: bf16[192,96], index: 6, kind: input, shape index: {}]   ;;  %s3674_s2 = inlined_call_operand.vmem [shape: f32[1,192], index: 2, kind: input, shape index: {}]   ;;  %s3675_s3 = inlined_call_operand.vmem [shape: bf16[5,96,64], index: 3, kind: input, shape index: {}]   ;;  %s3676_s7 = inlined_call_operand.vmem [shape: bf16[32,64], index: 7, kind: input, shape index: {}]   ;;  %s3677_s4 = inlined_call_operand.vmem [shape: f32[1,64], index: 4, kind: input, shape index: {}]   ;;  %s3678_s9 = inlined_call_operand.vmem [shape: bf16[64,10], index: 9, kind: input, shape index: {}]   ;;  %s3679_s8 = inlined_call_operand.vmem [shape: f32[1,64], index: 8, kind: input, shape index: {}]   ;;  %s3680_s10 = inlined_call_operand.vmem [shape: f32[1,10], index: 10, kind: input, shape index: {}]   ;;  %s3681_s11 = inlined_call_operand.vmem [shape: f32[8,10], index: 11, kind: output, shape index: {}]  }
   0x1   :  { %v2631_v0 = vld [vmem:[%s3670_s1 + $0x74] ss:$8 sps:$4 sm:$0xff]   ;;  %202 = vmatprep.mubr.bf16.mxu0 %v2785_v1  ;;  %383 = vmatprep.mubr.bf16.mxu1 %v2785_v1  ;;  %v2635_v3 = vld [vmem:[%s3670_s1 + $0x70] ss:$8 sps:$4 sm:$0xff]   ;;  %v2637_v5 = vld [vmem:[%s3670_s1 + $0x64] ss:$8 sps:$4 sm:$0xff]  }
   0x2   :  { %v2633_v2 = vld [vmem:[%s3670_s1 + $0x34] ss:$8 sps:$4 sm:$0xff]   ;;  %178 = vmatprep.subr.bf16.mxu0 %v2631_v0  ;;  %v2636_v4 = vld [vmem:[%s3670_s1 + $0x30] ss:$8 sps:$4 sm:$0xff]   ;;  %v2639_v6 = vld [vmem:[%s3670_s1 + $0x24] ss:$8 sps:$4 sm:$0xff]  }
   0x3   :  { %359 = vmatprep.subr.bf16.mxu1 %v2633_v2  ;;  %179 = vmatpush1.bf16.msra.mxu0 %v2635_v3  ;;  %v2641_v7 = vld [vmem:[%s3670_s1 + $0x60] ss:$8 sps:$4 sm:$0xff]   ;;  %v2643_v9 = vld [vmem:[%s3670_s1 + $0x54] ss:$8 sps:$4 sm:$0xff]   ;;  %v2647_v11 = vld [vmem:[%s3670_s1 + $0x50] ss:$8 sps:$4 sm:$0xff]  }
   0x4   :  { %360 = vmatpush1.bf16.msra.mxu1 %v2636_v4  ;;  %180 = vmatprep.subr.bf16.mxu0 %v2637_v5  ;;  %v2642_v8 = vld [vmem:[%s3670_s1 + $0x20] ss:$8 sps:$4 sm:$0xff]   ;;  %v2645_v10 = vld [vmem:[%s3670_s1 + $0x14] ss:$8 sps:$4 sm:$0xff]   ;;  %v2648_v12 = vld [vmem:[%s3670_s1 + $0x10] ss:$8 sps:$4 sm:$0xff]  }
   0x5   :  { %361 = vmatprep.subr.bf16.mxu1 %v2639_v6  ;;  %v2649_v13 = vld [vmem:[%s3670_s1 + $0x44] ss:$8 sps:$4 sm:$0xff]   ;;  %v2653_v15 = vld [vmem:[%s3670_s1 + $0x40] ss:$8 sps:$4 sm:$0xff]   ;;  %v2659_v17 = vld [vmem:[%s3670_s1 + $0xb4] ss:$8 sps:$4 sm:$0xff]  }
   0x6   :  { %v2651_v14 = vld [vmem:[%s3670_s1 + $0x4] ss:$8 sps:$4 sm:$0xff]   ;;  %v2654_v16 = vld [vmem:[%s3670_s1] ss:$8 sps:$4 sm:$0xff]   ;;  %v2657_v20 = vld [vmem:[%s3670_s1 + $0xb0] ss:$8 sps:$4 sm:$0xff]  }
   0x7   :  { %181 = vmatpush1.bf16.msra.mxu0 %v2641_v7  ;;  %v2655_v18 = vld [vmem:[%s3671_s0 + $0x4] sm:$0xff]   ;;  %v2660_v23 = vld [vmem:[%s3671_s0 + $0xc] sm:$0xff]   ;;  %v2671_v24 = vld [vmem:[%s3670_s1 + $0x94] ss:$8 sps:$4 sm:$0xff]   ;;  %vm2034_vm3 = vcmask 261120   ;;  %vm2162_vm4 = vcmask 80896  }
   0x8   :  { %362 = vmatpush1.bf16.msra.mxu1 %v2642_v8  ;;  %182 = vmatprep.subr.bf16.mxu0 %v2643_v9  ;;  %v2656_v19 = vld [vmem:[%s3671_s0] sm:$0xff]   ;;  %v2661_v25 = vld [vmem:[%s3671_s0 + $0x8] sm:$0xff]   ;;  %v2669_v26 = vld [vmem:[%s3670_s1 + $0x90] ss:$8 sps:$4 sm:$0xff]  }
   0x9   :  { %363 = vmatprep.subr.bf16.mxu1 %v2645_v10  ;;  %v2664_v21 = vld [vmem:[%s3670_s1 + $0xa4] ss:$8 sps:$4 sm:$0xff]   ;;  %v2662_v22 = vld [vmem:[%s3670_s1 + $0xa0] ss:$8 sps:$4 sm:$0xff]   ;;  %v2676_v27 = vld [vmem:[%s3670_s1 + $0xf4] ss:$8 sps:$4 sm:$0xff]  }
   0xa   :  { %v2674_v28 = vld [vmem:[%s3670_s1 + $0xf0] ss:$8 sps:$4 sm:$0xff]   ;;  %v2679_v29 = vld [vmem:[%s3670_s1 + $0x84] ss:$8 sps:$4 sm:$0xff]   ;;  %v2677_v31 = vld [vmem:[%s3670_s1 + $0x80] ss:$8 sps:$4 sm:$0xff]  }
   0xb   :  { %183 = vmatpush1.bf16.msra.mxu0 %v2647_v11  ;;  %v2682_v30 = vld [vmem:[%s3670_s1 + $0xe4] ss:$8 sps:$4 sm:$0xff]   ;;  %v2680_v32 = vld [vmem:[%s3670_s1 + $0xe0] ss:$8 sps:$4 sm:$0xff]   ;;  %v2665_v33 = vld [vmem:[%s3671_s0 + $0x14] sm:$0xff]  }
   0xc   :  { %364 = vmatpush1.bf16.msra.mxu1 %v2648_v12  ;;  %184 = vmatprep.subr.bf16.mxu0 %v2649_v13  ;;  %v2666_v34 = vld [vmem:[%s3671_s0 + $0x10] sm:$0xff]   ;;  %v2690_v37 = vld [vmem:[%s3670_s1 + $0xc4] ss:$8 sps:$4 sm:$0xff]   ;;  %v2688_v39 = vld [vmem:[%s3670_s1 + $0xc0] ss:$8 sps:$4 sm:$0xff]  }
   0xd   :  { %365 = vmatprep.subr.bf16.mxu1 %v2651_v14  ;;  %v2687_v35 = vld [vmem:[%s3670_s1 + $0xd4] ss:$8 sps:$4 sm:$0xff]   ;;  %v2685_v36 = vld [vmem:[%s3670_s1 + $0xd0] ss:$8 sps:$4 sm:$0xff]   ;;  %v2672_v42 = vld [vmem:[%s3671_s0 + $0x24] sm:$0xff]  }
   0xe   :  { %v2694_v38 = vld [vmem:[%s3670_s1 + $0x134] ss:$8 sps:$4 sm:$0xff]   ;;  %v2673_v43 = vld [vmem:[%s3671_s0 + $0x20] sm:$0xff]   ;;  %v2683_v44 = vld [vmem:[%s3671_s0 + $0x2c] sm:$0xff]  }
   0xf   :  { %185 = vmatpush1.bf16.msra.mxu0 %v2653_v15  ;;  %v2667_v40 = vld [vmem:[%s3671_s0 + $0x1c] sm:$0xff]   ;;  %v2684_v45 = vld [vmem:[%s3671_s0 + $0x28] sm:$0xff]   ;;  %v2692_v48 = vld [vmem:[%s3670_s1 + $0x130] ss:$8 sps:$4 sm:$0xff]  }
  0x10   :  { %366 = vmatpush1.bf16.msra.mxu1 %v2654_v16  ;;  %562 = vmatprep.subr.bf16.mxu0 %v2659_v17  ;;  %v2668_v41 = vld [vmem:[%s3671_s0 + $0x18] sm:$0xff]   ;;  %v2691_v46 = vld [vmem:[%s3671_s0 + $0x8] sm:$0xff]   ;;  %v2696_v52 = vld [vmem:[%s3671_s0 + $0x10] sm:$0xff]  }
  0x11   :  { %789 = vmatprep.subr.bf16.mxu1 %v2676_v27  ;;  %v2695_v47 = vld [vmem:[%s3671_s0 + $0xc] sm:$0xff]   ;;  %v2698_v50 = vld [vmem:[%s3670_s1 + $0x120] ss:$8 sps:$4 sm:$0xff]   ;;  %v2706_v51 = vld [vmem:[%s3670_s1 + $0x114] ss:$8 sps:$4 sm:$0xff]  }
  0x12   :  { %2214 = vmatmul.mubr.msk.bf16.vlgmr.msra.gmra.mxu0 %vm151_vm0, %v2655_v18  ;;  %v2700_v49 = vld [vmem:[%s3670_s1 + $0x124] ss:$8 sps:$4 sm:$0xff]   ;;  %v2697_v53 = vld [vmem:[%s3671_s0 + $0x14] sm:$0xff]   ;;  %v2710_v56 = vld [vmem:[%s3670_s1 + $0x100] ss:$8 sps:$4 sm:$0xff]  }
  0x13   :  { %2234 = vmatmul.mubr.msk.bf16.vlgmr.msra.gmra.mxu1 %vm151_vm0, %v2656_v19  ;;  %563 = vmatpush1.bf16.msra.mxu0 %v2657_v20  ;;  %v2704_v54 = vld [vmem:[%s3670_s1 + $0x110] ss:$8 sps:$4 sm:$0xff]   ;;  %v2712_v55 = vld [vmem:[%s3670_s1 + $0x104] ss:$8 sps:$4 sm:$0xff]   ;;  %v2702_v58 = vld [vmem:[%s3671_s0 + $0x1c] sm:$0xff]  }
  0x14   :  { %212 = vmatprep.mubr.bf16.mxu0 %v2785_v1  ;;  %393 = vmatprep.mubr.bf16.mxu1 %v2785_v1  ;;  %v2701_v57 = vld [vmem:[%s3671_s0 + $0x18] sm:$0xff]   ;;  %v2703_v59 = vld [vmem:[%s3671_s0 + $0x20] sm:$0xff]   ;;  %v2708_v61 = vld [vmem:[%s3671_s0 + $0x28] sm:$0xff]  }
  0x15   :  { %564 = vmatprep.subr.bf16.mxu0 %v2664_v21  ;;  %790 = vmatpush1.bf16.msra.mxu1 %v2674_v28  ;;  %v2707_v60 = vld [vmem:[%s3671_s0 + $0x24] sm:$0xff]   ;;  %v2709_v62 = vld [vmem:[%s3671_s0 + $0x2c] sm:$0xff]   ;;  %v2714_v0 = vld [vmem:[%s3671_s0 + $0x34] sm:$0xff]  }
  0x16   :  { %791 = vmatprep.subr.bf16.mxu1 %v2682_v30  ;;  %v2713_v63 = vld [vmem:[%s3671_s0 + $0x30] sm:$0xff]   ;;  %v2716_v3 = vld [vmem:[%s3671_s0 + $0x18] sm:$0xff]   ;;  %v2717_v4 = vld [vmem:[%s3671_s0 + $0x20] sm:$0xff]  }
  0x17   :  { %565 = vmatpush1.bf16.msra.mxu0 %v2662_v22  ;;  %v2715_v2 = vld [vmem:[%s3671_s0 + $0x10] sm:$0xff]   ;;  %v2718_v5 = vld [vmem:[%s3671_s0 + $0x28] sm:$0xff]   ;;  %v2720_v7 = vld [vmem:[%s3671_s0 + $0x38] sm:$0xff]  }
  0x18   :  { %566 = vmatprep.subr.bf16.mxu0 %v2671_v24  ;;  %v2719_v6 = vld [vmem:[%s3671_s0 + $0x30] sm:$0xff]   ;;  %v2721_v8 = vld [vmem:[%s3672_s5 + $0x38] sm:$0xff]   ;;  %v2725_v12 = vld [vmem:[%s3672_s5 + $0x28] sm:$0xff]  }
  0x19   :  { %792 = vmatpush1.bf16.msra.mxu1 %v2680_v32  ;;  %v2722_v9 = vld [vmem:[%s3673_s6 + $0x38] sm:$0xff]   ;;  %v2723_v10 = vld [vmem:[%s3672_s5 + $0x30] sm:$0xff]   ;;  %v2726_v13 = vld [vmem:[%s3673_s6 + $0x28] sm:$0xff]  }
  0x1a   :  { %2215 = vmatmul.mubr.msk.bf16.gmra.mxu0 %vm151_vm0, %v2660_v23  ;;  %793 = vmatprep.subr.bf16.mxu1 %v2687_v35  ;;  %v2724_v11 = vld [vmem:[%s3673_s6 + $0x30] sm:$0xff]   ;;  %v2727_v14 = vld [vmem:[%s3672_s5 + $0x20] sm:$0xff]   ;;  %v2729_v16 = vld [vmem:[%s3672_s5 + $0x18] sm:$0xff]  }
  0x1b   :  { %2235 = vmatmul.mubr.msk.bf16.gmra.mxu1 %vm151_vm0, %v2661_v25  ;;  %222 = vmatprep.mubr.bf16.mxu0 %v2785_v1  ;;  %v2728_v15 = vld [vmem:[%s3673_s6 + $0x20] sm:$0xff]   ;;  %v2730_v17 = vld [vmem:[%s3673_s6 + $0x18] sm:$0xff]   ;;  %v2731_v18 = vld [vmem:[%s3672_s5 + $0x10] sm:$0xff]  }
  0x1c   :  { %403 = vmatprep.mubr.bf16.mxu1 %v2785_v1  ;;  %567 = vmatpush1.bf16.msra.mxu0 %v2669_v26  ;;  %v2732_v19 = vld [vmem:[%s3673_s6 + $0x10] sm:$0xff]   ;;  %v2733_v20 = vld [vmem:[%s3672_s5 + $0x8] sm:$0xff]   ;;  %v2735_v22 = vld [vmem:[%s3672_s5] sm:$0xff]  }
  0x1d   :  { %568 = vmatprep.subr.bf16.mxu0 %v2679_v29  ;;  %794 = vmatpush1.bf16.msra.mxu1 %v2685_v36  ;;  %v2734_v21 = vld [vmem:[%s3673_s6 + $0x8] sm:$0xff]   ;;  %v2736_v23 = vld [vmem:[%s3673_s6] sm:$0xff]   ;;  %v2737_v24 = vld [vmem:[%s3672_s5 + $0x58] sm:$0xff]  }
  0x1e   :  { %795 = vmatprep.subr.bf16.mxu1 %v2690_v37  ;;  %v2738_v25 = vld [vmem:[%s3673_s6 + $0x58] sm:$0xff]   ;;  %v2739_v26 = vld [vmem:[%s3672_s5 + $0x50] sm:$0xff]   ;;  %v2741_v28 = vld [vmem:[%s3672_s5 + $0x48] sm:$0xff]  }
  0x1f   :  { %v2740_v27 = vld [vmem:[%s3673_s6 + $0x50] sm:$0xff]   ;;  %v2742_v29 = vld [vmem:[%s3673_s6 + $0x48] sm:$0xff]   ;;  %v2743_v30 = vld [vmem:[%s3672_s5 + $0x40] sm:$0xff]  }
  0x20   :  { %569 = vmatpush1.bf16.msra.mxu0 %v2677_v31  ;;  %v2744_v31 = vld [vmem:[%s3673_s6 + $0x40] sm:$0xff]  }
  0x21   :  { %1016 = vmatprep.subr.bf16.mxu0 %v2694_v38  ;;  %796 = vmatpush1.bf16.msra.mxu1 %v2688_v39 }
  0x22   :  { %2216 = vmatmul.mubr.msk.bf16.gmra.mxu0 %vm151_vm0, %v2665_v33  ;;  %1284 = vmatprep.subr.bf16.mxu1 %v2785_v1 }
  0x23   :  { %2236 = vmatmul.mubr.msk.bf16.gmra.mxu1 %vm151_vm0, %v2666_v34  ;;  %232 = vmatprep.mubr.bf16.mxu0 %v2785_v1 }
  0x24   :  { %413 = vmatprep.mubr.bf16.mxu1 %v2785_v1 }
  0x2a   :  { %2217 = vmatmul.mubr.msk.bf16.gmra.mxu0 %vm151_vm0, %v2667_v40 }
  0x2b   :  { %2237 = vmatmul.mubr.msk.bf16.gmra.mxu1 %vm151_vm0, %v2668_v41  ;;  %242 = vmatprep.mubr.bf16.mxu0 %v2785_v1 }
  0x2c   :  { %423 = vmatprep.mubr.bf16.mxu1 %v2785_v1 }
  0x32   :  { %2218 = vmatmul.mubr.msk.bf16.gmra.mxu0 %vm151_vm0, %v2672_v42 }
  0x33   :  { %2238 = vmatmul.mubr.msk.bf16.gmra.mxu1 %vm151_vm0, %v2673_v43  ;;  %252 = vmatprep.mubr.bf16.mxu0 %v2785_v1 }
  0x34   :  { %433 = vmatprep.mubr.bf16.mxu1 %v2785_v1 }
  0x3a   :  { %2219 = vmatmul.mubr.msk.bf16.gmra.mxu0 %vm151_vm0, %v2683_v44 }
  0x3b   :  { %2239 = vmatmul.mubr.msk.bf16.gmra.mxu1 %vm151_vm0, %v2684_v45  ;;  %586 = vmatprep.mubr.bf16.mxu0 %v2785_v1 }
  0x3c   :  { %813 = vmatprep.mubr.bf16.mxu1 %v2785_v1 }
  0x42   :  { %2274 = vmatmul.mubr.msk.bf16.vlgmr.msra.gmra.mxu0 %vm151_vm0, %v2691_v46 }
  0x43   :  { %2314 = vmatmul.mubr.msk.bf16.vlgmr.msra.gmra.mxu1 %vm151_vm0, %v2695_v47  ;;  %1017 = vmatpush1.bf16.msra.mxu0 %v2692_v48 }
  0x44   :  { %596 = vmatprep.mubr.bf16.mxu0 %v2785_v1  ;;  %823 = vmatprep.mubr.bf16.mxu1 %v2785_v1 }
  0x45   :  { %1018 = vmatprep.subr.bf16.mxu0 %v2700_v49  ;;  %1285 = vmatpush1.bf16.msra.mxu1 %v2721_v8 }
  0x46   :  { %1286 = vmatprep.subr.bf16.mxu1 %v2785_v1 }
  0x47   :  { %1019 = vmatpush1.bf16.msra.mxu0 %v2698_v50 }
  0x48   :  { %1020 = vmatprep.subr.bf16.mxu0 %v2706_v51 }
  0x49   :  { %1287 = vmatpush1.bf16.msra.mxu1 %v2723_v10 }
  0x4a   :  { %2275 = vmatmul.mubr.msk.bf16.gmra.mxu0 %vm151_vm0, %v2696_v52  ;;  %1288 = vmatprep.subr.bf16.mxu1 %v2785_v1 }
  0x4b   :  { %2315 = vmatmul.mubr.msk.bf16.gmra.mxu1 %vm151_vm0, %v2697_v53  ;;  %606 = vmatprep.mubr.bf16.mxu0 %v2785_v1 }
  0x4c   :  { %833 = vmatprep.mubr.bf16.mxu1 %v2785_v1  ;;  %1021 = vmatpush1.bf16.msra.mxu0 %v2704_v54 }
  0x4d   :  { %1022 = vmatprep.subr.bf16.mxu0 %v2712_v55  ;;  %1289 = vmatpush1.bf16.msra.mxu1 %v2725_v12 }
  0x4e   :  { %1290 = vmatprep.subr.bf16.mxu1 %v2785_v1 }
  0x50   :  { %1023 = vmatpush1.bf16.msra.mxu0 %v2710_v56 }
  0x51   :  { %1437 = vmatprep.subr.bf16.mxu0 %v2785_v1  ;;  %1291 = vmatpush1.bf16.msra.mxu1 %v2727_v14 }
  0x52   :  { %2276 = vmatmul.mubr.msk.bf16.gmra.mxu0 %vm151_vm0, %v2701_v57  ;;  %1292 = vmatprep.subr.bf16.mxu1 %v2785_v1 }
  0x53   :  { %2316 = vmatmul.mubr.msk.bf16.gmra.mxu1 %vm151_vm0, %v2702_v58  ;;  %616 = vmatprep.mubr.bf16.mxu0 %v2785_v1 }
  0x54   :  { %843 = vmatprep.mubr.bf16.mxu1 %v2785_v1 }
  0x55   :  { %1293 = vmatpush1.bf16.msra.mxu1 %v2729_v16 }
  0x56   :  { %1294 = vmatprep.subr.bf16.mxu1 %v2785_v1 }
  0x59   :  { %1295 = vmatpush1.bf16.msra.mxu1 %v2731_v18 }
  0x5a   :  { %2277 = vmatmul.mubr.msk.bf16.gmra.mxu0 %vm151_vm0, %v2703_v59  ;;  %1296 = vmatprep.subr.bf16.mxu1 %v2785_v1 }
  0x5b   :  { %2317 = vmatmul.mubr.msk.bf16.gmra.mxu1 %vm151_vm0, %v2707_v60  ;;  %626 = vmatprep.mubr.bf16.mxu0 %v2785_v1 }
  0x5c   :  { %853 = vmatprep.mubr.bf16.mxu1 %v2785_v1 }
  0x5d   :  { %1297 = vmatpush1.bf16.msra.mxu1 %v2733_v20 }
  0x5e   :  { %1298 = vmatprep.subr.bf16.mxu1 %v2785_v1 }
  0x61   :  { %1299 = vmatpush1.bf16.msra.mxu1 %v2735_v22 }
  0x62   :  { %2278 = vmatmul.mubr.msk.bf16.gmra.mxu0 %vm151_vm0, %v2708_v61  ;;  %1308 = vmatprep.subr.bf16.mxu1 %v2785_v1 }
  0x63   :  { %2318 = vmatmul.mubr.msk.bf16.gmra.mxu1 %vm151_vm0, %v2709_v62  ;;  %636 = vmatprep.mubr.bf16.mxu0 %v2785_v1 }
  0x64   :  { %863 = vmatprep.mubr.bf16.mxu1 %v2785_v1 }
  0x65   :  { %1309 = vmatpush2.bf16.msra.mxu1 %v2737_v24 }
  0x66   :  { %1310 = vmatprep.subr.bf16.mxu1 %v2785_v1 }
  0x69   :  { %1311 = vmatpush2.bf16.msra.mxu1 %v2739_v26 }
  0x6a   :  { %2279 = vmatmul.mubr.msk.bf16.gmra.mxu0 %vm151_vm0, %v2713_v63  ;;  %1312 = vmatprep.subr.bf16.mxu1 %v2785_v1 }
  0x6b   :  { %2319 = vmatmul.mubr.msk.bf16.gmra.mxu1 %vm151_vm0, %v2714_v0  ;;  %1040 = vmatprep.mubr.bf16.mxu0 %v2785_v1 }
  0x6d   :  { %1313 = vmatpush2.bf16.msra.mxu1 %v2741_v28 }
  0x6e   :  { %1314 = vmatprep.subr.bf16.mxu1 %v2785_v1 }
  0x71   :  { %1315 = vmatpush2.bf16.msra.mxu1 %v2743_v30 }
  0x72   :  { %2354 = vmatmul.mubr.msk.bf16.vlgmr.msra.gmra.mxu0 %vm151_vm0, %v2715_v2 }
  0x73   :  { %1050 = vmatprep.mubr.bf16.mxu0 %v2785_v1  ;;  %1438 = vmatpush1.bf16.msra.mxu0 %v2722_v9 }
  0x74   :  { %1439 = vmatprep.subr.bf16.mxu0 %v2785_v1 }
  0x77   :  { %1440 = vmatpush1.bf16.msra.mxu0 %v2724_v11 }
  0x78   :  { %1441 = vmatprep.subr.bf16.mxu0 %v2785_v1 }
  0x7a   :  { %2355 = vmatmul.mubr.msk.bf16.gmra.mxu0 %vm151_vm0, %v2716_v3 }
  0x7b   :  { %1060 = vmatprep.mubr.bf16.mxu0 %v2785_v1  ;;  %1442 = vmatpush1.bf16.msra.mxu0 %v2726_v13 }
  0x7c   :  { %1443 = vmatprep.subr.bf16.mxu0 %v2785_v1 }
  0x7f   :  { %1444 = vmatpush1.bf16.msra.mxu0 %v2728_v15 }
  0x80   :  { %1445 = vmatprep.subr.bf16.mxu0 %v2785_v1 }
  0x82   :  { %2356 = vmatmul.mubr.msk.bf16.gmra.mxu0 %vm151_vm0, %v2717_v4 }
  0x83   :  { %1070 = vmatprep.mubr.bf16.mxu0 %v2785_v1  ;;  %1446 = vmatpush1.bf16.msra.mxu0 %v2730_v17 }
  0x84   :  { %1447 = vmatprep.subr.bf16.mxu0 %v2785_v1 }
  0x87   :  { %1448 = vmatpush1.bf16.msra.mxu0 %v2732_v19 }
  0x88   :  { %1449 = vmatprep.subr.bf16.mxu0 %v2785_v1 }
  0x8a   :  { %2357 = vmatmul.mubr.msk.bf16.gmra.mxu0 %vm151_vm0, %v2718_v5 }
  0x8b   :  { %1080 = vmatprep.mubr.bf16.mxu0 %v2785_v1  ;;  %1450 = vmatpush1.bf16.msra.mxu0 %v2734_v21 }
  0x8c   :  { %1451 = vmatprep.subr.bf16.mxu0 %v2785_v1 }
  0x8f   :  { %1452 = vmatpush1.bf16.msra.mxu0 %v2736_v23 }
  0x90   :  { %1461 = vmatprep.subr.bf16.mxu0 %v2785_v1 }
  0x92   :  { %2358 = vmatmul.mubr.msk.bf16.gmra.mxu0 %vm151_vm0, %v2719_v6 }
  0x93   :  { %1090 = vmatprep.mubr.bf16.mxu0 %v2785_v1  ;;  %1462 = vmatpush2.bf16.msra.mxu0 %v2738_v25 }
  0x94   :  { %1463 = vmatprep.subr.bf16.mxu0 %v2785_v1 }
  0x97   :  { %1464 = vmatpush2.bf16.msra.mxu0 %v2740_v27 }
  0x98   :  { %1465 = vmatprep.subr.bf16.mxu0 %v2785_v1 }
  0x9a   :  { %2359 = vmatmul.mubr.msk.bf16.gmra.mxu0 %vm151_vm0, %v2720_v7 }
  0x9b   :  { %1466 = vmatpush2.bf16.msra.mxu0 %v2742_v29 }
  0x9c   :  { %1467 = vmatprep.subr.bf16.mxu0 %v2785_v1 }
  0x9f   :  { %1468 = vmatpush2.bf16.msra.mxu0 %v2744_v31 }
  0xd2   :  { %v3215_v32 = vpop.f32.mrf.mxu0 }
  0xd3   :  { %v3217_v33 = vpop.f32.mrf.mxu1 }
  0xd4   :  { %v3219_v34 = vpop.f32.mrf.mxu0 }
  0xd5   :  { %v3221_v35 = vpop.f32.mrf.mxu1 }
  0xd6   :  { %v3223_v36 = vpop.f32.mrf.mxu0 }
  0xd7   :  { %v3225_v1 = vpop.f32.mrf.mxu1 }
  0xd8   :  { %v3227_v37 = vpop.f32.mrf.mxu0 }
  0xd9   :  { %v3229_v38 = vpop.f32.mrf.mxu1 }
  0xda   :  { %v3231_v39 = vpop.f32.mrf.mxu0 }
  0xdb   :  { %v3233_v40 = vpop.f32.mrf.mxu1 }
  0xdc   :  { %v3235_v41 = vpop.f32.mrf.mxu0 }
  0xdd   :  { %v3237_v42 = vpop.f32.mrf.mxu1 }
  0xde   :  { %v3239_v43 = vpop.f32.mrf.mxu0 }
  0xdf   :  { %v3241_v44 = vpop.f32.mrf.mxu1 }
  0xe0   :  { %v3243_v45 = vpop.f32.mrf.mxu0 }
  0xe1   :  { %v3245_v46 = vpop.f32.mrf.mxu1 }
  0xe2   :  { %v3247_v47 = vpop.f32.mrf.mxu0 }
  0xe3   :  { %v3249_v48 = vpop.f32.mrf.mxu1 }
  0xe4   :  { %v3251_v49 = vpop.f32.mrf.mxu0 }
  0xe5   :  { %v3253_v50 = vpop.f32.mrf.mxu1 }
  0xe6   :  { %v3255_v51 = vpop.f32.mrf.mxu0 }
  0xe7   :  { %v3257_v52 = vpop.f32.mrf.mxu1 }
  0xe8   :  { %v3259_v53 = vpop.f32.mrf.mxu0 }
  0xe9   :  { %v3261_v54 = vpop.f32.mrf.mxu1 }
  0xea   :  { %v3263_v55 = vpop.f32.mrf.mxu0 }
  0xeb   :  { %v3265_v56 = vpop.f32.mrf.mxu1 }
  0xec   :  { %v3267_v57 = vpop.f32.mrf.mxu0 }
  0xed   :  { %v3269_v58 = vpop.f32.mrf.mxu1 }
  0xee   :  { %v3271_v59 = vpop.f32.mrf.mxu0 }
  0xef   :  { %v3273_v60 = vpop.f32.mrf.mxu1 }
  0xf0   :  { %3682 = vst [vmem:[#allocation2_spill] sm:$0xff] %v3273_v60  ;;  %v3275_v61 = vpop.f32.mrf.mxu0 }
  0xf1   :  { %3683 = vst [vmem:[#allocation3_spill] sm:$0xff] %v3275_v61  ;;  %v3277_v62 = vpop.f32.mrf.mxu1 }
  0xf2   :  { %3684 = vst [vmem:[#allocation4_spill] sm:$0xff] %v3277_v62  ;;  %v3279_v63 = vpop.f32.mrf.mxu0 }
  0xf3   :  { %3685 = vst [vmem:[#allocation5_spill] sm:$0xff] %v3279_v63  ;;  %v3281_v0 = vpop.f32.mrf.mxu1  ;;  %v1127_v63 = vlaneseq }
  0xf4   :  { %3686 = vst [vmem:[#allocation6_spill] sm:$0xff] %v3281_v0  ;;  %v3283_v2 = vpop.f32.mrf.mxu0 }
  0xf5   :  { %3687 = vst [vmem:[#allocation7_spill] sm:$0xff] %v3283_v2  ;;  %v3285_v3 = vpop.f32.mrf.mxu1 }
  0xf6   :  { %3688 = vst [vmem:[#allocation8_spill] sm:$0xff] %v3285_v3  ;;  %v3287_v4 = vpop.f32.mrf.mxu0 }
  0xf7   :  { %3689 = vst [vmem:[#allocation9_spill] sm:$0xff] %v3287_v4  ;;  %v3289_v5 = vpop.f32.mrf.mxu1 }
  0xf8   :  { %3690 = vst [vmem:[#allocation10_spill] sm:$0xff] %v3289_v5  ;;  %v3291_v6 = vpop.f32.mrf.mxu0 }
  0xf9   :  { %3691 = vst [vmem:[#allocation11_spill] sm:$0xff] %v3291_v6  ;;  %v3293_v7 = vpop.f32.mrf.mxu1 }
  0xfa   :  { %3692 = vst [vmem:[#allocation12_spill] sm:$0xff] %v3293_v7  ;;  %v3295_v8 = vpop.f32.mrf.mxu0 }
  0xfb   :  { %3693 = vst [vmem:[#allocation13_spill] sm:$0xff] %v3295_v8  ;;  %v3297_v9 = vpop.f32.mrf.mxu1 }
  0xfc   :  { %3694 = vst [vmem:[#allocation14_spill] sm:$0xff] %v3297_v9  ;;  %v3299_v10 = vpop.f32.mrf.mxu0 }
  0xfd   :  { %3695 = vst [vmem:[#allocation15_spill] sm:$0xff] %v3299_v10  ;;  %v3301_v11 = vpop.f32.mrf.mxu1 }
  0xfe   :  { %3696 = vst [vmem:[#allocation16_spill] sm:$0xff] %v3301_v11  ;;  %v3303_v12 = vpop.f32.mrf.mxu0 }
  0xff   :  { %3697 = vst [vmem:[#allocation17_spill] sm:$0xff] %v3303_v12  ;;  %v3305_v13 = vpop.f32.mrf.mxu1 }
 0x100   :  { %3698 = vst [vmem:[#allocation18_spill] sm:$0xff] %v3305_v13  ;;  %v3307_v14 = vpop.f32.mrf.mxu0 }
 0x101   :  { %3699 = vst [vmem:[#allocation19_spill] sm:$0xff] %v3307_v14  ;;  %v3309_v15 = vpop.f32.mrf.mxu1 }
 0x102   :  { %3700 = vst [vmem:[#allocation20_spill] sm:$0xff] %v3309_v15  ;;  %v588_v16 = vpop.f32.mrf.mxu0 }
 0x103   :  { %v815_v17 = vpop.f32.mrf.mxu1 }
 0x104   :  { %v590_v18 = vpop.f32.mrf.mxu0 }
 0x105   :  { %v817_v19 = vpop.f32.mrf.mxu1 }
 0x106   :  { %v592_v20 = vpop.f32.mrf.mxu0 }
 0x107   :  { %v819_v22 = vpop.f32.mrf.mxu1 }
 0x108   :  { %v594_v21 = vpop.f32.mrf.mxu0 }
 0x109   :  { %v821_v24 = vpop.f32.mrf.mxu1 }
 0x10a   :  { %v598_v23 = vpop.f32.mrf.mxu0 }
 0x10b   :  { %v3311_v27 = vpop.f32.mrf.mxu1 }
 0x10c   :  { %v600_v25 = vpop.f32.mrf.mxu0 }
 0x10d   :  { %v3317_v30 = vpop.f32.mrf.mxu1 }
 0x10e   :  { %v602_v26 = vpop.f32.mrf.mxu0 }
 0x10f   :  { %v3323_v14 = vpop.f32.mrf.mxu1 }
 0x110   :  { %v3313_v28 = vpop.f32.mrf.mxu0 }
 0x111   :  { %v3329_v11 = vpop.f32.mrf.mxu1 }
 0x112   :  { %v3315_v29 = vpop.f32.mrf.mxu0 }
 0x113   :  { %v3335_v8 = vpop.f32.mrf.mxu1 }
 0x114   :  { %v3319_v31 = vpop.f32.mrf.mxu0 }
 0x115   :  { %v3341_v5 = vpop.f32.mrf.mxu1 }
 0x116   :  { %v3321_v15 = vpop.f32.mrf.mxu0 }
 0x117   :  { %v3347_v2 = vpop.f32.mrf.mxu1 }
 0x118   :  { %v3325_v13 = vpop.f32.mrf.mxu0 }
 0x11a   :  { %v3327_v12 = vpop.f32.mrf.mxu0 }
 0x11b   :  { %3701 = vst [vmem:[#allocation21_spill] sm:$0xff] %v3327_v12 }
 0x11c   :  { %v3331_v10 = vpop.f32.mrf.mxu0 }
 0x11d   :  { %3702 = vst [vmem:[#allocation22_spill] sm:$0xff] %v3331_v10 }
 0x11e   :  { %v3333_v9 = vpop.f32.mrf.mxu0 }
 0x11f   :  { %3703 = vst [vmem:[#allocation23_spill] sm:$0xff] %v3333_v9  ;;  %v3353_v9 = vpop.f32.mrf.mxu1 }
 0x120   :  { %v3337_v7 = vpop.f32.mrf.mxu0  ;;  %3710 = vst [vmem:[#allocation30_spill] sm:$0xff] %v3353_v9 }
 0x121   :  { %3704 = vst [vmem:[#allocation24_spill] sm:$0xff] %v3337_v7  ;;  %v1128_v7 = vshrl.u32 %v1127_v63, 7  ;;  %v3365_v12 = vpop.f32.mrf.mxu1  ;;  %v1125_v63 = vld [vmem:[%s3674_s2] sm:$0x3] }
 0x122   :  { %v3339_v6 = vpop.f32.mrf.mxu0 }
 0x123   :  { %3705 = vst [vmem:[#allocation25_spill] sm:$0xff] %v3339_v6  ;;  %v386_v6 = vadd.f32 %v3217_v33, %v3215_v32  ;;  %v1129_v32 = vsub.s32 0, %v1128_v7 }
 0x124   :  { %v3343_v4 = vpop.f32.mrf.mxu0 }
 0x125   :  { %3706 = vst [vmem:[#allocation26_spill] sm:$0xff] %v3343_v4  ;;  %v390_v4 = vadd.f32 %v3225_v1, %v3223_v36  ;;  %v396_v36 = vadd.f32 %v3233_v40, %v3231_v39  ;;  %v3376_v1 = vpop.f32.mrf.mxu1 }
 0x126   :  { %v3345_v3 = vpop.f32.mrf.mxu0 }
 0x127   :  { %3707 = vst [vmem:[#allocation27_spill] sm:$0xff] %v3345_v3  ;;  %v388_v3 = vadd.f32 %v3221_v35, %v3219_v34  ;;  %v649_v60 = vadd.f32 %v592_v20, %v390_v4  ;;  %v1133_v34 = vsub.s32 1, %v1128_v7  ;;  %v651_v4 = vadd.f32 %v598_v23, %v396_v36 }
 0x128   :  { %v3349_v0 = vpop.f32.mrf.mxu0 }
 0x129   :  { %3708 = vst [vmem:[#allocation28_spill] sm:$0xff] %v3349_v0  ;;  %v647_v0 = vadd.f32 %v588_v16, %v386_v6  ;;  %v648_v9 = vadd.f32 %v590_v18, %v388_v3  ;;  %v398_v3 = vadd.f32 %v3237_v42, %v3235_v41  ;;  %v3382_v18 = vrot.slane %v1125_v63, %v1133_v34 }
 0x12a   :  { %v3351_v10 = vpop.f32.mrf.mxu0  ;;  %v410_v34 = vadd.f32 %v3257_v52, %v3255_v51 }
 0x12b   :  { %3709 = vst [vmem:[#allocation29_spill] sm:$0xff] %v3351_v10  ;;  %v874_v35 = vadd.f32 %v815_v17, %v647_v0  ;;  %v875_v16 = vadd.f32 %v817_v19, %v648_v9  ;;  %v402_v9 = vadd.f32 %v3245_v46, %v3243_v45  ;;  %v3388_v17 = vpop.f32.mrf.mxu1  ;;  %v406_v46 = vadd.f32 %v3249_v48, %v3247_v47 }
 0x12c   :  { %v3355_v62 = vpop.f32.mrf.mxu0 }
 0x12d   :  { %3711 = vst [vmem:[#allocation31_spill] sm:$0xff] %v3355_v62  ;;  %v392_v62 = vadd.f32 %v3229_v38, %v3227_v37  ;;  %v3378_v38 = vrot.slane %v1125_v63, %v1129_v32 }
 0x12e   :  { %v3359_v61 = vpop.f32.mrf.mxu0 }
 0x12f   :  { %3712 = vst [vmem:[#allocation32_spill] sm:$0xff] %v3359_v61  ;;  %v650_v61 = vadd.f32 %v594_v21, %v392_v62  ;;  %v400_v62 = vadd.f32 %v3241_v44, %v3239_v43  ;;  %v654_v43 = vadd.f32 %v3313_v28, %v402_v9  ;;  %v408_v28 = vadd.f32 %v3253_v50, %v3251_v49  ;;  %v3715_v9 = vld [vmem:[#allocation21_spill] sm:$0xff] }
 0x130   :  { %v3367_v10 = vpop.f32.mrf.mxu0  ;;  %v657_v49 = vadd.f32 %v3321_v15, %v410_v34 }
 0x131   :  { %3713 = vst [vmem:[#allocation33_spill] sm:$0xff] %v3367_v10  ;;  %v876_v10 = vadd.f32 %v819_v22, %v649_v60  ;;  %v877_v0 = vadd.f32 %v821_v24, %v650_v61  ;;  %v652_v60 = vadd.f32 %v600_v25, %v398_v3  ;;  %v653_v20 = vadd.f32 %v602_v26, %v400_v62 }
 0x132   :  { %v1042_v33 = vpop.f32.mrf.mxu0  ;;  %v878_v22 = vadd.f32 %v3311_v27, %v651_v4  ;;  %v881_v47 = vadd.f32 %v3329_v11, %v654_v43  ;;  %v3720_v43 = vld [vmem:[#allocation23_spill] sm:$0xff] }
 0x133   :  { %v1101_v37 = vadd.f32 %v1042_v33, %v874_v35  ;;  %v879_v25 = vadd.f32 %v3317_v30, %v652_v60  ;;  %v880_v26 = vadd.f32 %v3323_v14, %v653_v20  ;;  %v655_v33 = vadd.f32 %v3315_v29, %v406_v46  ;;  %v3716_v20 = vld [vmem:[#allocation30_spill] sm:$0xff] }
 0x134   :  { %v1044_v6 = vpop.f32.mrf.mxu0  ;;  %v412_v30 = vadd.f32 %v3261_v54, %v3259_v53  ;;  %v656_v14 = vadd.f32 %v3319_v31, %v408_v28  ;;  %v416_v31 = vadd.f32 %v3265_v56, %v3263_v55 }
 0x135   :  { %v1102_v39 = vadd.f32 %v1044_v6, %v875_v16  ;;  %v1137_v41 = vadd.f32 %v3378_v38, %v1101_v37  ;;  %v882_v51 = vadd.f32 %v3335_v8, %v655_v33  ;;  %v3722_v33 = vld [vmem:[#allocation5_spill] sm:$0xff] }
 0x136   :  { %v1046_v7 = vpop.f32.mrf.mxu0  ;;  %v658_v11 = vadd.f32 %v3325_v13, %v412_v30  ;;  %v883_v15 = vadd.f32 %v3341_v5, %v656_v14  ;;  %v418_v13 = vadd.f32 %v3269_v58, %v3267_v57  ;;  %v659_v60 = vadd.f32 %v3715_v9, %v416_v31 }
 0x137   :  { %v1103_v40 = vadd.f32 %v1046_v7, %v876_v10  ;;  %v1138_v44 = vadd.f32 %v3382_v18, %v1102_v39  ;;  %v3398_v10 = vpop.f32.mrf.mxu1  ;;  %v884_v7 = vadd.f32 %v3347_v2, %v657_v49  ;;  %v3714_v39 = vld [vmem:[#allocation2_spill] sm:$0xff]  ;;  %v3725_v49 = vld [vmem:[#allocation8_spill] sm:$0xff] }
 0x138   :  { %v1048_v19 = vpop.f32.mrf.mxu0  ;;  %v885_v55 = vadd.f32 %v3716_v20, %v658_v11  ;;  %v886_v46 = vadd.f32 %v3365_v12, %v659_v60  ;;  %v3728_v11 = vld [vmem:[#allocation10_spill] sm:$0xff] }
 0x139   :  { %v1139_v42 = vadd.f32 %v3378_v38, %v1103_v40  ;;  %v1104_v21 = vadd.f32 %v1048_v19, %v877_v0  ;;  %v3411_v36 = vpop.f32.mrf.mxu1  ;;  %v420_v40 = vadd.f32 %v3714_v39, %v3271_v59 }
 0x13a   :  { %v1052_v23 = vpop.f32.mrf.mxu0 }
 0x13b   :  { %v1161_v61 = vmax.f32 %v1137_v41, %v1139_v42  ;;  %v1140_v45 = vadd.f32 %v3382_v18, %v1104_v21  ;;  %v1105_v27 = vadd.f32 %v1052_v23, %v878_v22  ;;  %v857_v3 = vpop.f32.mrf.mxu1  ;;  %v3717_v42 = vld [vmem:[#allocation3_spill] sm:$0xff]  ;;  %v3718_v21 = vld [vmem:[#allocation4_spill] sm:$0xff]  ;;  %v3719_v22 = vld [vmem:[#allocation22_spill] sm:$0xff] }
 0x13c   :  { %v1054_v24 = vpop.f32.mrf.mxu0  ;;  %v422_v2 = vadd.f32 %v3718_v21, %v3717_v42  ;;  %v660_v23 = vadd.f32 %v3719_v22, %v418_v13  ;;  %v3735_v42 = vld [vmem:[#allocation14_spill] sm:$0xff] }
 0x13d   :  { %v1162_v32 = vmax.f32 %v1138_v44, %v1140_v45  ;;  %v1106_v48 = vadd.f32 %v1054_v24, %v879_v25  ;;  %v1141_v50 = vadd.f32 %v3378_v38, %v1105_v27  ;;  %v661_v44 = vadd.f32 %v3720_v43, %v420_v40  ;;  %v3721_v25 = vld [vmem:[#allocation24_spill] sm:$0xff] }
 0x13e   :  { %v1056_v63 = vpop.f32.mrf.mxu0 }
 0x13f   :  { %v1107_v35 = vadd.f32 %v1056_v63, %v880_v26  ;;  %v1142_v37 = vadd.f32 %v3382_v18, %v1106_v48  ;;  %v662_v26 = vadd.f32 %v3721_v25, %v422_v2  ;;  %v3723_v63 = vld [vmem:[#allocation6_spill] sm:$0xff]  ;;  %v888_v30 = vadd.f32 %v3388_v17, %v661_v44 }
 0x140   :  { %v1058_v6 = vpop.f32.mrf.mxu0  ;;  %v426_v34 = vadd.f32 %v3723_v63, %v3722_v33 }
 0x141   :  { %v1143_v29 = vadd.f32 %v3378_v38, %v1107_v35  ;;  %v1108_v16 = vadd.f32 %v1058_v6, %v881_v47  ;;  %v887_v35 = vadd.f32 %v3376_v1, %v660_v23  ;;  %v3724_v6 = vld [vmem:[#allocation7_spill] sm:$0xff] }
 0x142   :  { %v1062_v52 = vpop.f32.mrf.mxu0 }
 0x143   :  { %v1163_v53 = vmax.f32 %v1141_v50, %v1143_v29  ;;  %v1144_v54 = vadd.f32 %v3382_v18, %v1108_v16  ;;  %v1109_v8 = vadd.f32 %v1062_v52, %v882_v51  ;;  %v428_v50 = vadd.f32 %v3725_v49, %v3724_v6  ;;  %v3726_v29 = vld [vmem:[#allocation25_spill] sm:$0xff]  ;;  %v3744_v6 = vld [vmem:[#allocation32_spill] sm:$0xff] }
 0x144   :  { %v1064_v4 = vpop.f32.mrf.mxu0  ;;  %v663_v16 = vadd.f32 %v3726_v29, %v426_v34  ;;  %v3727_v52 = vld [vmem:[#allocation9_spill] sm:$0xff] }
 0x145   :  { %v1173_v62 = vpack.c.bf16 %v1163_v53, %v1161_v61  ;;  %v1164_v0 = vmax.f32 %v1142_v37, %v1144_v54  ;;  %v1110_v5 = vadd.f32 %v1064_v4, %v883_v15  ;;  %v859_v61 = vpop.f32.mrf.mxu1  ;;  %v1145_v58 = vadd.f32 %v3378_v38, %v1109_v8  ;;  %v3729_v15 = vld [vmem:[#allocation11_spill] sm:$0xff]  ;;  %v3730_v4 = vld [vmem:[#allocation12_spill] sm:$0xff] }
 0x146   :  { %v1066_v19 = vpop.f32.mrf.mxu0  ;;  %v430_v37 = vadd.f32 %v3728_v11, %v3727_v52  ;;  %v889_v53 = vadd.f32 %v3398_v10, %v662_v26  ;;  %v432_v1 = vadd.f32 %v3730_v4, %v3729_v15  ;;  %v3732_v8 = vld [vmem:[#allocation27_spill] sm:$0xff]  ;;  %v890_v60 = vadd.f32 %v3411_v36, %v663_v16  ;;  %v3733_v10 = vld [vmem:[#allocation28_spill] sm:$0xff]  ;;  %v3740_v26 = vld [vmem:[#allocation29_spill] sm:$0xff] }
 0x147   :  { %v1174_v56 = vpack.c.bf16 %v1164_v0, %v1162_v32  ;;  %v1111_v41 = vadd.f32 %v1066_v19, %v884_v7  ;;  %v1146_v32 = vadd.f32 %v3382_v18, %v1110_v5  ;;  %v861_v47 = vpop.f32.mrf.mxu1  ;;  %v3731_v7 = vld [vmem:[#allocation26_spill] sm:$0xff]  ;;  %v3737_v36 = vld [vmem:[#allocation16_spill] sm:$0xff]  ;;  %v3745_v52 = vld [vmem:[#allocation33_spill] sm:$0xff] }
 0x148   :  { %v1068_v57 = vpop.f32.mrf.mxu0  ;;  %v664_v17 = vadd.f32 %v3731_v7, %v428_v50  ;;  %v665_v13 = vadd.f32 %v3732_v8, %v430_v37  ;;  %v666_v20 = vadd.f32 %v3733_v10, %v432_v1 }
 0x149   :  { %v1147_v59 = vadd.f32 %v3378_v38, %v1111_v41  ;;  %v1112_v45 = vadd.f32 %v1068_v57, %v885_v55  ;;  %2372 = vmatprep.mubr.msk.bf16.mxu1 %vm151_vm0, %v1174_v56  ;;  %2387 = vmatprep.mubr.msk.bf16.mxu0 %vm151_vm0, %v1174_v56  ;;  %v3734_v41 = vld [vmem:[#allocation13_spill] sm:$0xff] }
 0x14a   :  { %v1072_v24 = vpop.f32.mrf.mxu0  ;;  %1317 = vmatmul.mubr.bf16.vlgmr.msra.gmra.mxu1 %v1173_v62  ;;  %1470 = vmatmul.mubr.bf16.vlgmr.msra.gmra.mxu0 %v1173_v62  ;;  %v865_v62 = vpop.f32.mrf.mxu1  ;;  %v436_v21 = vadd.f32 %v3735_v42, %v3734_v41  ;;  %v891_v2 = vadd.f32 %v857_v3, %v664_v17  ;;  %v892_v43 = vadd.f32 %v859_v61, %v665_v13  ;;  %v3741_v3 = vld [vmem:[#allocation19_spill] sm:$0xff]  ;;  %v2747_v42 = vld [vmem:[%s3675_s3 + $0x80] sm:$0xff]  }
 0x14b   :  { %v1165_v27 = vmax.f32 %v1145_v58, %v1147_v59  ;;  %v1148_v28 = vadd.f32 %v3382_v18, %v1112_v45  ;;  %v1113_v14 = vadd.f32 %v1072_v24, %v886_v46  ;;  %v3736_v59 = vld [vmem:[#allocation15_spill] sm:$0xff]  ;;  %v3738_v46 = vld [vmem:[#allocation17_spill] sm:$0xff]  ;;  %v3739_v24 = vld [vmem:[#allocation18_spill] sm:$0xff]  ;;  %v893_v33 = vadd.f32 %v861_v47, %v666_v20 }
 0x14c   :  { %v1074_v48 = vpop.f32.mrf.mxu0  ;;  %v867_v22 = vpop.f32.mrf.mxu1  ;;  %v438_v45 = vadd.f32 %v3737_v36, %v3736_v59  ;;  %v440_v25 = vadd.f32 %v3739_v24, %v3738_v46  ;;  %v3743_v61 = vld [vmem:[#allocation31_spill] sm:$0xff]  ;;  %v2756_v59 = vld [vmem:[%s3675_s3 + $0x30] sm:$0xff]  }
 0x14d   :  { %v1166_v12 = vmax.f32 %v1146_v32, %v1148_v28  ;;  %v1114_v54 = vadd.f32 %v1074_v48, %v887_v35  ;;  %v1149_v39 = vadd.f32 %v3378_v38, %v1113_v14  ;;  %v667_v32 = vadd.f32 %v3740_v26, %v436_v21  ;;  %v3742_v35 = vld [vmem:[#allocation20_spill] sm:$0xff]  ;;  %v2745_v41 = vld [vmem:[%s3675_s3 + $0x88] sm:$0xff]  }
 0x14e   :  { %v1076_v51 = vpop.f32.mrf.mxu0  ;;  %v668_v14 = vadd.f32 %v3743_v61, %v438_v45  ;;  %v869_v49 = vpop.f32.mrf.mxu1  ;;  %v2748_v21 = vld [vmem:[%s3675_s3 + $0x50] sm:$0xff]  }
 0x14f   :  { %v1115_v31 = vadd.f32 %v1076_v51, %v888_v30  ;;  %v1150_v55 = vadd.f32 %v3382_v18, %v1114_v54  ;;  %v442_v30 = vadd.f32 %v3742_v35, %v3741_v3  ;;  %v894_v47 = vadd.f32 %v865_v62, %v667_v32 }
 0x150   :  { %v1078_v0 = vpop.f32.mrf.mxu0  ;;  %v895_v4 = vadd.f32 %v867_v22, %v668_v14  ;;  %v2750_v22 = vld [vmem:[%s3675_s3 + $0x48] sm:$0xff]  }
 0x151   :  { %v1151_v40 = vadd.f32 %v3378_v38, %v1115_v31  ;;  %v1116_v9 = vadd.f32 %v1078_v0, %v889_v53  ;;  %v670_v11 = vadd.f32 %v3745_v52, %v442_v30  ;;  %v871_v31 = vpop.f32.mrf.mxu1 }
 0x152   :  { %v1082_v19 = vpop.f32.mrf.mxu0 }
 0x153   :  { %v1167_v56 = vmax.f32 %v1149_v39, %v1151_v40  ;;  %v1152_v5 = vadd.f32 %v3382_v18, %v1116_v9  ;;  %v1117_v57 = vadd.f32 %v1082_v19, %v890_v60  ;;  %v897_v8 = vadd.f32 %v871_v31, %v670_v11 }
 0x154   :  { %v1084_v23 = vpop.f32.mrf.mxu0 }
 0x155   :  { %v1168_v44 = vmax.f32 %v1150_v55, %v1152_v5  ;;  %v1175_v58 = vpack.c.bf16 %v1167_v56, %v1165_v27  ;;  %v1118_v34 = vadd.f32 %v1084_v23, %v891_v2  ;;  %v669_v27 = vadd.f32 %v3744_v6, %v440_v25  ;;  %v2749_v2 = vld [vmem:[%s3675_s3 + $0x78] sm:$0xff]   ;;  %v2751_v23 = vld [vmem:[%s3675_s3 + $0x70] sm:$0xff]  }
 0x156   :  { %v1086_v28 = vpop.f32.mrf.mxu0  ;;  %v1153_v29 = vadd.f32 %v3378_v38, %v1117_v57  ;;  %v2754_v57 = vld [vmem:[%s3675_s3 + $0x38] sm:$0xff]  }
 0x157   :  { %v1176_v63 = vpack.c.bf16 %v1168_v44, %v1166_v12  ;;  %v1119_v48 = vadd.f32 %v1086_v28, %v892_v43  ;;  %v1154_v37 = vadd.f32 %v3382_v18, %v1118_v34  ;;  %v896_v1 = vadd.f32 %v869_v49, %v669_v27  ;;  %v2752_v43 = vld [vmem:[%s3675_s3 + $0x40] sm:$0xff]   ;;  %v2753_v44 = vld [vmem:[%s3675_s3 + $0x68] sm:$0xff]  }
 0x158   :  { %v1088_v50 = vpop.f32.mrf.mxu0 }
 0x159   :  { %v1155_v16 = vadd.f32 %v3378_v38, %v1119_v48  ;;  %v1120_v51 = vadd.f32 %v1088_v50, %v893_v33  ;;  %2373 = vmatprep.mubr.msk.bf16.mxu1 %vm151_vm0, %v1176_v63  ;;  %2388 = vmatprep.mubr.msk.bf16.mxu0 %vm151_vm0, %v1176_v63 }
 0x15a   :  { %v1092_v12 = vpop.f32.mrf.mxu0  ;;  %1325 = vmatmul.mubr.bf16.gmra.mxu1 %v1175_v58  ;;  %1478 = vmatmul.mubr.bf16.gmra.mxu0 %v1175_v58  ;;  %v2755_v58 = vld [vmem:[%s3675_s3 + $0x60] sm:$0xff]  }
 0x15b   :  { %v1169_v53 = vmax.f32 %v1153_v29, %v1155_v16  ;;  %v1156_v54 = vadd.f32 %v3382_v18, %v1120_v51  ;;  %v1121_v17 = vadd.f32 %v1092_v12, %v894_v47  ;;  %v2757_v12 = vld [vmem:[%s3675_s3 + $0xe8] sm:$0xff]  }
 0x15c   :  { %v1094_v15 = vpop.f32.mrf.mxu0 }
 0x15d   :  { %v1170_v7 = vmax.f32 %v1154_v37, %v1156_v54  ;;  %v1122_v13 = vadd.f32 %v1094_v15, %v895_v4  ;;  %v1157_v40 = vadd.f32 %v3378_v38, %v1121_v17  ;;  %v2759_v54 = vld [vmem:[%s3675_s3 + $0xe0] sm:$0xff]  }
 0x15e   :  { %v1096_v0 = vpop.f32.mrf.mxu0 }
 0x15f   :  { %v1123_v62 = vadd.f32 %v1096_v0, %v896_v1  ;;  %v1158_v19 = vadd.f32 %v3382_v18, %v1122_v13  ;;  %v2760_v1 = vld [vmem:[%s3675_s3 + $0x20] sm:$0xff]  }
 0x160   :  { %v1098_v39 = vpop.f32.mrf.mxu0 }
 0x161   :  { %v1159_v9 = vadd.f32 %v3378_v38, %v1123_v62  ;;  %v1124_v60 = vadd.f32 %v1098_v39, %v897_v8  ;;  %v2786_v38 = vmov 0.0   ;;  %v2762_v62 = vld [vmem:[%s3675_s3 + $0x18] sm:$0xff]   ;;  %v2763_v39 = vld [vmem:[%s3675_s3 + $0xd0] sm:$0xff]  }
 0x162   :  { %2559 = vmatprep.subr.bf16.mxu0 %v2786_v38  ;;  %2527 = vmatprep.subr.bf16.mxu1 %v2786_v38 }
 0x163   :  { %v1171_v10 = vmax.f32 %v1157_v40, %v1159_v9  ;;  %v1160_v20 = vadd.f32 %v3382_v18, %v1124_v60  ;;  %2560 = vmatpush3.bf16.msra.mxu0 %v2745_v41  ;;  %v2746_v18 = vld [vmem:[%s3675_s3 + $0x58] sm:$0xff]   ;;  %v2764_v60 = vld [vmem:[%s3675_s3 + $0x10] sm:$0xff]  }
 0x164   :  { %2561 = vmatprep.subr.bf16.mxu0 %v2786_v38  ;;  %2528 = vmatpush3.bf16.msra.mxu1 %v2746_v18  ;;  %v2768_v18 = vld [vmem:[%s3675_s3] sm:$0xff]  }
 0x165   :  { %v1172_v55 = vmax.f32 %v1158_v19, %v1160_v20  ;;  %v1177_v56 = vpack.c.bf16 %v1171_v10, %v1169_v53  ;;  %2529 = vmatprep.subr.bf16.mxu1 %v2786_v38  ;;  %v2758_v53 = vld [vmem:[%s3675_s3 + $0x28] sm:$0xff]  }
 0x166   :  { %v2765_v19 = vld [vmem:[%s3675_s3 + $0xc8] sm:$0xff]  }
 0x167   :  { %v1178_v5 = vpack.c.bf16 %v1172_v55, %v1170_v7  ;;  %2562 = vmatpush3.bf16.msra.mxu0 %v2747_v42  ;;  %v2761_v7 = vld [vmem:[%s3675_s3 + $0xd8] sm:$0xff]   ;;  %v2766_v55 = vld [vmem:[%s3675_s3 + $0x8] sm:$0xff]  }
 0x168   :  { %2563 = vmatprep.subr.bf16.mxu0 %v2786_v38  ;;  %2530 = vmatpush3.bf16.msra.mxu1 %v2748_v21  ;;  %v2769_v21 = vld [vmem:[%s3675_s3 + $0xb8] sm:$0xff]  }
 0x169   :  { %2374 = vmatprep.mubr.msk.bf16.mxu1 %vm151_vm0, %v1178_v5  ;;  %2389 = vmatprep.mubr.msk.bf16.mxu0 %vm151_vm0, %v1178_v5 }
 0x16a   :  { %1333 = vmatmul.mubr.bf16.gmra.mxu1 %v1177_v56  ;;  %1486 = vmatmul.mubr.bf16.gmra.mxu0 %v1177_v56  ;;  %v2767_v56 = vld [vmem:[%s3675_s3 + $0xc0] sm:$0xff]  }
 0x16b   :  { %2564 = vmatpush3.bf16.msra.mxu0 %v2749_v2  ;;  %2531 = vmatprep.subr.bf16.mxu1 %v2786_v38  ;;  %v2770_v2 = vld [vmem:[%s3675_s3 + $0xb0] sm:$0xff]  }
 0x16c   :  { %2565 = vmatprep.subr.bf16.mxu0 %v2786_v38  ;;  %2532 = vmatpush3.bf16.msra.mxu1 %v2750_v22  ;;  %v2771_v22 = vld [vmem:[%s3675_s3 + $0xa8] sm:$0xff]  }
 0x16d   :  { %2533 = vmatprep.subr.bf16.mxu1 %v2786_v38  ;;  %2571 = vmatprep.mubr.msk.bf16.mxu0 %vm2787_vm1, %v2786_v38 }
 0x16e   :  { %2539 = vmatprep.mubr.msk.bf16.mxu1 %vm2787_vm1, %v2786_v38 }
 0x16f   :  { %2566 = vmatpush3.bf16.msra.mxu0 %v2751_v23  ;;  %v2772_v23 = vld [vmem:[%s3675_s3 + $0xa0] sm:$0xff]  }
 0x170   :  { %2567 = vmatprep.subr.bf16.mxu0 %v2786_v38  ;;  %2534 = vmatpush3.bf16.msra.mxu1 %v2752_v43  ;;  %v2773_v43 = vld [vmem:[%s3675_s3 + $0x98] sm:$0xff]  }
 0x171   :  { %2535 = vmatprep.subr.bf16.mxu1 %v2786_v38 }
 0x173   :  { %2568 = vmatpush3.bf16.msra.mxu0 %v2753_v44  ;;  %v2774_v44 = vld [vmem:[%s3675_s3 + $0x90] sm:$0xff]  }
 0x174   :  { %2569 = vmatprep.subr.bf16.mxu0 %v2786_v38  ;;  %2536 = vmatpush3.bf16.msra.mxu1 %v2754_v57 }
 0x175   :  { %2537 = vmatprep.subr.bf16.mxu1 %v2786_v38 }
 0x177   :  { %2570 = vmatpush3.bf16.msra.mxu0 %v2755_v58 }
 0x178   :  { %2591 = vmatprep.subr.bf16.mxu0 %v2786_v38  ;;  %2538 = vmatpush3.bf16.msra.mxu1 %v2756_v59 }
 0x179   :  { %2543 = vmatprep.subr.bf16.mxu1 %v2786_v38 }
 0x20a   :  { %v1318_v36 = vpop.f32.mrf.mxu1  ;;  %v1471_v45 = vpop.f32.mrf.mxu0 }
 0x20b   :  { %v1494_v48 = vmax.f32 %v1318_v36, %v1471_v45  ;;  %v2775_v36 = vld [vmem:[%s3676_s7 + $0x8] sm:$0xff]  }
 0x20c   :  { %v1320_v46 = vpop.f32.mrf.mxu1  ;;  %v1473_v24 = vpop.f32.mrf.mxu0 }
 0x20d   :  { %v1500_v27 = vmax.f32 %v1494_v48, 0.0 }
 0x20e   :  { %v1321_v25 = vpop.f32.mrf.mxu1  ;;  %v1474_v26 = vpop.f32.mrf.mxu0 }
 0x20f   :  { %v1495_v33 = vmax.f32 %v1321_v25, %v1474_v26 }
 0x210   :  { %v1323_v32 = vpop.f32.mrf.mxu1  ;;  %v1476_v28 = vpop.f32.mrf.mxu0 }
 0x211   :  { %v1501_v30 = vmax.f32 %v1495_v33, 0.0 }
 0x213   :  { %v1506_v16 = vpack.c.bf16 %v1501_v30, %v1500_v27 }
 0x215   :  { %v1513_v11 = vunpack.c.h.b16 %v1506_v16 }
 0x21a   :  { %v1326_v63 = vpop.f32.mrf.mxu1  ;;  %v1479_v34 = vpop.f32.mrf.mxu0 }
 0x21b   :  { %v1496_v61 = vmax.f32 %v1326_v63, %v1479_v34 }
 0x21c   :  { %v1328_v3 = vpop.f32.mrf.mxu1  ;;  %v1481_v35 = vpop.f32.mrf.mxu0 }
 0x21d   :  { %v1502_v51 = vmax.f32 %v1496_v61, 0.0 }
 0x21e   :  { %v1329_v14 = vpop.f32.mrf.mxu1  ;;  %v1482_v6 = vpop.f32.mrf.mxu0 }
 0x21f   :  { %v1497_v49 = vmax.f32 %v1329_v14, %v1482_v6 }
 0x220   :  { %v1331_v50 = vpop.f32.mrf.mxu1  ;;  %v1484_v29 = vpop.f32.mrf.mxu0 }
 0x221   :  { %v1503_v47 = vmax.f32 %v1497_v49, 0.0 }
 0x223   :  { %v3543_v52 = vpack.c.bf16 %v1503_v47, %v1502_v51 }
 0x225   :  { %v1514_v37 = vunpack.c.l.b16 %v3543_v52  ;;  %2572 = vmatmul.mubr.msk.bf16.vlgmr.msra.gmra.mxu0 %vm1580_vm2, %v3543_v52  ;;  %v1515_v58 = vunpack.c.h.b16 %v3543_v52 }
 0x226   :  { %2592 = vmatpush3.bf16.msra.mxu0 %v2757_v12  ;;  %2603 = vmatprep.mubr.msk.bf16.mxu0 %vm2787_vm1, %v2786_v38 }
 0x227   :  { %v1543_v31 = vpack.c.b16 %v1514_v37, %v1513_v11  ;;  %2593 = vmatprep.subr.bf16.mxu0 %v2786_v38 }
 0x229   :  { %2540 = vmatmul.mubr.msk.bf16.vlgmr.msra.gmra.mxu1 %vm1580_vm2, %v1543_v31 }
 0x22a   :  { %2544 = vmatpush3.bf16.msra.mxu1 %v2758_v53  ;;  %2594 = vmatpush3.bf16.msra.mxu0 %v2759_v54  ;;  %v1334_v15 = vpop.f32.mrf.mxu1  ;;  %v1487_v4 = vpop.f32.mrf.mxu0  ;;  %v2473_v53 = vld [vmem:[%s3677_s4] ss:$0 sm:$0xff] }
 0x22b   :  { %2545 = vmatprep.subr.bf16.mxu1 %v2786_v38  ;;  %2595 = vmatprep.subr.bf16.mxu0 %v2786_v38  ;;  %v1498_v20 = vmax.f32 %v1334_v15, %v1487_v4 }
 0x22c   :  { %v1336_v17 = vpop.f32.mrf.mxu1  ;;  %v1489_v0 = vpop.f32.mrf.mxu0  ;;  %2555 = vmatprep.mubr.msk.bf16.mxu1 %vm2787_vm1, %v2786_v38 }
 0x22d   :  { %v1504_v41 = vmax.f32 %v1498_v20, 0.0  ;;  %v2777_v0 = vld [vmem:[%s3678_s9 + $0x18] sm:$0xff]  }
 0x22e   :  { %2546 = vmatpush3.bf16.msra.mxu1 %v2760_v1  ;;  %2596 = vmatpush3.bf16.msra.mxu0 %v2761_v7  ;;  %v1337_v8 = vpop.f32.mrf.mxu1  ;;  %v1490_v13 = vpop.f32.mrf.mxu0 }
 0x22f   :  { %2547 = vmatprep.subr.bf16.mxu1 %v2786_v38  ;;  %2597 = vmatprep.subr.bf16.mxu0 %v2786_v38  ;;  %v1499_v10 = vmax.f32 %v1337_v8, %v1490_v13  ;;  %v2778_v13 = vld [vmem:[%s3678_s9 + $0x10] sm:$0xff]  }
 0x230   :  { %v1339_v40 = vpop.f32.mrf.mxu1  ;;  %v1492_v9 = vpop.f32.mrf.mxu0 }
 0x231   :  { %v1505_v5 = vmax.f32 %v1499_v10, 0.0  ;;  %v2474_v40 = vld [vmem:[%s3679_s8] ss:$0 sm:$0xff] }
 0x232   :  { %2548 = vmatpush3.bf16.msra.mxu1 %v2762_v62  ;;  %2598 = vmatpush3.bf16.msra.mxu0 %v2763_v39  ;;  %v2779_v62 = vld [vmem:[%s3678_s9 + $0x8] sm:$0xff]   ;;  %v2780_v39 = vld [vmem:[%s3678_s9] sm:$0xff]  }
 0x233   :  { %2549 = vmatprep.subr.bf16.mxu1 %v2786_v38  ;;  %2599 = vmatprep.subr.bf16.mxu0 %v2786_v38  ;;  %v1508_v42 = vpack.c.bf16 %v1505_v5, %v1504_v41 }
 0x235   :  { %v1516_v57 = vunpack.c.l.b16 %v1508_v42 }
 0x236   :  { %2550 = vmatpush3.bf16.msra.mxu1 %v2764_v60  ;;  %2600 = vmatpush3.bf16.msra.mxu0 %v2765_v19 }
 0x237   :  { %2551 = vmatprep.subr.bf16.mxu1 %v2786_v38  ;;  %2601 = vmatprep.subr.bf16.mxu0 %v2786_v38  ;;  %v1815_v59 = vpack.c.b16 %v1516_v57, %v1515_v58 }
 0x23a   :  { %2552 = vmatpush3.bf16.msra.mxu1 %v2766_v55  ;;  %2602 = vmatpush3.bf16.msra.mxu0 %v2767_v56 }
 0x23b   :  { %2553 = vmatprep.subr.bf16.mxu1 %v2786_v38 }
 0x23d   :  { %2604 = vmatmul.mubr.msk.bf16.vlgmr.msra.gmra.mxu0 %vm1580_vm2, %v1508_v42 }
 0x23e   :  { %2554 = vmatpush3.bf16.msra.mxu1 %v2768_v18 }
 0x23f   :  { %2575 = vmatprep.subr.bf16.mxu1 %v2786_v38 }
 0x241   :  { %2556 = vmatmul.mubr.msk.bf16.vlgmr.msra.gmra.mxu1 %vm1580_vm2, %v1506_v16  ;;  %v2776_v16 = vld [vmem:[%s3676_s7] sm:$0xff]  }
 0x242   :  { %2576 = vmatpush3.bf16.msra.mxu1 %v2769_v21  ;;  %2587 = vmatprep.mubr.msk.bf16.mxu1 %vm2787_vm1, %v2786_v38 }
 0x243   :  { %2577 = vmatprep.subr.bf16.mxu1 %v2786_v38 }
 0x246   :  { %2578 = vmatpush3.bf16.msra.mxu1 %v2770_v2 }
 0x247   :  { %2579 = vmatprep.subr.bf16.mxu1 %v2786_v38 }
 0x24a   :  { %2580 = vmatpush3.bf16.msra.mxu1 %v2771_v22 }
 0x24b   :  { %2581 = vmatprep.subr.bf16.mxu1 %v2786_v38 }
 0x24e   :  { %2582 = vmatpush3.bf16.msra.mxu1 %v2772_v23 }
 0x24f   :  { %2583 = vmatprep.subr.bf16.mxu1 %v2786_v38 }
 0x252   :  { %2584 = vmatpush3.bf16.msra.mxu1 %v2773_v43 }
 0x253   :  { %2585 = vmatprep.subr.bf16.mxu1 %v2786_v38 }
 0x256   :  { %2586 = vmatpush3.bf16.msra.mxu1 %v2774_v44 }
 0x257   :  { %2607 = vmatprep.subr.bf16.mxu1 %v2786_v38 }
 0x259   :  { %2588 = vmatmul.mubr.msk.bf16.vlgmr.msra.gmra.mxu1 %vm1580_vm2, %v1815_v59 }
 0x25a   :  { %2611 = vmatprep.mubr.msk.bf16.mxu1 %vm2787_vm1, %v2786_v38  ;;  %2608 = vmatpush3.bf16.msra.mxu1 %v2775_v36 }
 0x25b   :  { %2609 = vmatprep.subr.bf16.mxu1 %v2786_v38 }
 0x25e   :  { %2610 = vmatpush3.bf16.msra.mxu1 %v2776_v16 }
 0x25f   :  { %2615 = vmatprep.subr.bf16.mxu1 %v2786_v38 }
 0x2e5   :  { %v1793_v45 = vpop.f32.mrf.mxu0 }
 0x2e7   :  { %v2573_v46 = vpop.f32.mrf.mxu0 }
 0x2e9   :  { %v1618_v24 = vpop.f32.mrf.mxu1  ;;  %v1796_v25 = vpop.f32.mrf.mxu0 }
 0x2eb   :  { %v2541_v26 = vpop.f32.mrf.mxu1  ;;  %v2574_v32 = vpop.f32.mrf.mxu0 }
 0x2ed   :  { %v1621_v28 = vpop.f32.mrf.mxu1 }
 0x2ef   :  { %v2542_v33 = vpop.f32.mrf.mxu1 }
 0x2fd   :  { %v1985_v63 = vpop.f32.mrf.mxu0 }
 0x2ff   :  { %v2605_v34 = vpop.f32.mrf.mxu0 }
 0x301   :  { %v1699_v48 = vpop.f32.mrf.mxu1  ;;  %v1988_v3 = vpop.f32.mrf.mxu0 }
 0x302   :  { %v1700_v6 = vadd.f32 %v1699_v48, %v1618_v24 }
 0x303   :  { %v2557_v35 = vpop.f32.mrf.mxu1  ;;  %v2606_v30 = vpop.f32.mrf.mxu0 }
 0x304   :  { %v1800_v49 = vadd.f32 %v1793_v45, %v1700_v6 }
 0x305   :  { %v1702_v61 = vpop.f32.mrf.mxu1 }
 0x306   :  { %v1703_v27 = vadd.f32 %v1702_v61, %v1621_v28 }
 0x307   :  { %v2558_v14 = vpop.f32.mrf.mxu1 }
 0x308   :  { %v1801_v47 = vadd.f32 %v1796_v25, %v1703_v27 }
 0x319   :  { %v1889_v50 = vpop.f32.mrf.mxu1 }
 0x31a   :  { %v1896_v29 = vadd.f32 %v1889_v50, %v1800_v49 }
 0x31b   :  { %v2589_v51 = vpop.f32.mrf.mxu1 }
 0x31c   :  { %v1992_v52 = vadd.f32 %v1985_v63, %v1896_v29 }
 0x31d   :  { %v1892_v12 = vpop.f32.mrf.mxu1 }
 0x31e   :  { %v1897_v11 = vadd.f32 %v1892_v12, %v1801_v47  ;;  %v2001_v31 = vadd.f32 %v2473_v53, %v1992_v52 }
 0x31f   :  { %v2590_v37 = vpop.f32.mrf.mxu1 }
 0x320   :  { %v1993_v54 = vadd.f32 %v1988_v3, %v1897_v11 }
 0x322   :  { %v2002_v15 = vadd.f32 %v2473_v53, %v1993_v54 }
 0x324   :  { %v2003_v4 = vmax.f32 %v2001_v31, %v2002_v15 }
 0x326   :  { %2005 = vrot.lane.b32.xlu0 %v2003_v4, %s2788_s23 }
 0x398   :  { %v2006_v1 = vpop.permute.xlu0 %2005 }
 0x399   :  { %v2008_v7 = vmax.f32 %v2003_v4, %v2006_v1 }
 0x39b   :  { %v2009_v17 = vmax.f32 %v2008_v7, 0.0 }
 0x39d   :  { %v2010_v8 = vpack.c.bf16 %v2009_v17, %v2009_v17 }
 0x39f   :  { %2612 = vmatmul.mubr.msk.bf16.vlgmr.msra.gmra.mxu1 %vm2034_vm3, %v2010_v8 }
 0x3a0   :  { %2616 = vmatpush3.bf16.msra.mxu1 %v2777_v0  ;;  %2623 = vmatprep.mubr.msk.bf16.mxu1 %vm2787_vm1, %v2786_v38 }
 0x3a1   :  { %2617 = vmatprep.subr.bf16.mxu1 %v2786_v38 }
 0x3a4   :  { %2618 = vmatpush3.bf16.msra.mxu1 %v2778_v13 }
 0x3a5   :  { %2619 = vmatprep.subr.bf16.mxu1 %v2786_v38 }
 0x3a8   :  { %2620 = vmatpush3.bf16.msra.mxu1 %v2779_v62 }
 0x3a9   :  { %2621 = vmatprep.subr.bf16.mxu1 %v2786_v38  ;;  %v2478_v38 = vld [vmem:[%s3680_s10] ss:$0 sm:$0xff] }
 0x3ac   :  { %2622 = vmatpush3.bf16.msra.mxu1 %v2780_v39 }
 0x45f   :  { %v2072_v9 = vpop.f32.mrf.mxu1 }
 0x460   :  { %v2073_v60 = vadd.f32 %v2474_v40, %v2072_v9 }
 0x461   :  { %v2613_v19 = vpop.f32.mrf.mxu1 }
 0x462   :  { %v2078_v10 = vmax.f32 %v2073_v60, 0.0 }
 0x463   :  { %v2075_v20 = vpop.f32.mrf.mxu1 }
 0x464   :  { %v2079_v55 = vpack.c.bf16 %v2078_v10, %v2078_v10 }
 0x465   :  { %v2614_v56 = vpop.f32.mrf.mxu1 }
 0x466   :  { %2624 = vmatmul.mubr.msk.bf16.vlgmr.msra.gmra.mxu1 %vm151_vm0, %v2079_v55 }
 0x526   :  { %v2156_v5 = vpop.f32.mrf.mxu1 }
 0x527   :  { %v2157_v41 = vadd.f32 %v2478_v38, %v2156_v5 }
 0x528   :  { %v2625_v18 = vpop.f32.mrf.mxu1 }
 0x529   :  { %v2163_v42 = vsel %vm2162_vm4, %v2157_v41, -inf }
 0x52a   :  { %2164 = vmax.xlane.f32.xlu0 %v2163_v42  ;;  %v2159_v21 = vpop.f32.mrf.mxu1 }
 0x52c   :  { %v2626_v2 = vpop.f32.mrf.mxu1 }
 0x5b3   :  { %v2165_v22 = vpop.xlane.xlu0 %2164 }
 0x5b4   :  { %v2166_v23 = vsub.f32 %v2157_v41, %v2165_v22 }
 0x5b6   :  { %v2167_v43 = vmul.f32 1.442695, %v2166_v23 }
 0x5b8   :  { %2781 = vpow2.f32 %v2167_v43 }
 0x5c5   :  { %v2782_v44 = vpop.eup %2781 }
 0x5c6   :  { %v2169_v57 = vsel %vm2162_vm4, %v2782_v44, 0.0 }
 0x5c7   :  { %2170 = vadd.xlane.f32.xlu1 %v2169_v57 }
 0x650   :  { %v2171_v58 = vpop.xlane.xlu1 %2170 }
 0x651   :  { %2783 = vlog2.f32 %v2171_v58 }
 0x65e   :  { %v2784_v59 = vpop.eup %2783 }
 0x65f   :  { %v2173_v36 = vmul.f32 0.6931472, %v2784_v59 }
 0x661   :  { %v2174_v45 = vsub.f32 %v2166_v23, %v2173_v36 }
 0x663   :  { %2175 = vst.msk [vmem:[%s3681_s11] sm:$0xff] %vm2162_vm4, %v2174_v45 }

</bundles_post_ra>
